<compile_context>
chip_gen: v5e
topology: v5e:2x2
jax: 0.10.0
libtpu: 0.0.40
codegen_flags: <defaults>
</compile_context>

<pallas_src>
import functools

import jax
import jax.numpy as jnp
from jax.experimental import pallas as pl
from jax.experimental.pallas import tpu as pltpu


_LANE_W = 512                      # lane-dense width of the flattened 2-D view
_SUBLANES = 8
_NUM_SPLITS = 2                    # leading "parallel" grid axis (2 TCs on v7x)
_TARGET_BLOCK_BYTES = 1024 * 1024  # ~1 MiB per input block (roofline sweet spot)


def _round_up(x, m):
    return (x + m - 1) // m * m


def _focal_loss_kernel(x_ref, t_ref, o_ref, *,
                       tiles_per_split, tile_rows, lane_w,
                       n_real_tiles, full_rows, rem,
                       has_ragged, has_skip):
    c = pl.program_id(0)           # split ("parallel")
    t = pl.program_id(1)           # row-tile within split ("arbitrary")
    tile_idx = c * tiles_per_split + t
    row0 = tile_idx * tile_rows

    @pl.when(t == 0)
    def _init():
        o_ref[...] = jnp.zeros_like(o_ref)

    def _accumulate(loss_tile):
        # Lane/sublane-parallel partial sums: reshaping (tile_rows, W) ->
        # (tile_rows//8, 8, W) is layout-free, and the axis-0 reduce is pure
        # elementwise vreg adds on the VPU (no cross-lane XLU, no scalar RMW).
        o_ref[...] += jnp.sum(
            loss_tile.reshape(tile_rows // _SUBLANES, _SUBLANES, lane_w), axis=0)

    def _compute():
        x = x_ref[...].astype(jnp.float32)
        tgt = t_ref[...].astype(jnp.float32)

        # pt = sigmoid(x) where target==1 else 1-sigmoid(x) == sigmoid(-x)
        pt = jax.nn.sigmoid(jnp.where(tgt == 1.0, x, -x))
        pt = jnp.clip(pt, 0.001, 0.999)
        omp = 1.0 - pt
        # (1-pt)^gamma with gamma = 0.5 where pt > 0.2 else 1.0:
        #   sqrt(omp) == omp * rsqrt(omp)  (omp >= 0.001 after the clip)
        pow_term = jnp.where(pt > 0.2, omp * jax.lax.rsqrt(omp), omp)
        loss = -pow_term * jnp.log(pt)

        if has_ragged:
            contains_pad = row0 + tile_rows > full_rows

            @pl.when(contains_pad)
            def _masked():
                ridx = row0 + jax.lax.broadcasted_iota(jnp.int32, loss.shape, 0)
                lidx = jax.lax.broadcasted_iota(jnp.int32, loss.shape, 1)
                # element is real iff its flat index < N*C
                real = jnp.logical_or(
                    ridx < full_rows,
                    jnp.logical_and(ridx == full_rows, lidx < rem))
                _accumulate(jnp.where(real, loss, 0.0))

            @pl.when(jnp.logical_not(contains_pad))
            def _plain():
                _accumulate(loss)
        else:
            _accumulate(loss)

    if has_skip:
        # Grid points that exist only to even out the 2-way split map (via a
        # clamped index_map) onto the last real block; skip them entirely.
        @pl.when(tile_idx < n_real_tiles)
        def _():
            _compute()
    else:
        _compute()


def focal_loss_adaptive(logits: jax.Array, target: jax.Array, *,
                        target_block_bytes: int = _TARGET_BLOCK_BYTES) -> jax.Array:
    """Pallas TPU implementation of FocalLossAdaptive.forward (gamma=1 variant)."""
    assert logits.shape == target.shape and logits.ndim == 2
    n, c = logits.shape
    total = n * c
    itemsize = max(jnp.dtype(logits.dtype).itemsize,
                   jnp.dtype(target.dtype).itemsize)

    # ---- lane-dense (rows, 512) view of the flattened problem ----------------
    rows = _round_up(pl.cdiv(total, _LANE_W), _SUBLANES)
    padded = rows * _LANE_W
    full_rows, rem = divmod(total, _LANE_W)

    x_flat = logits.reshape(-1)
    t_flat = target.reshape(-1)
    if padded != total:
        # One-off pad so the lane-dense reshape is legal; padded elements are
        # masked out of the reduction inside the kernel.
        x_flat = jnp.pad(x_flat, (0, padded - total))
        t_flat = jnp.pad(t_flat, (0, padded - total))
    x2d = x_flat.reshape(rows, _LANE_W)
    t2d = t_flat.reshape(rows, _LANE_W)

    # ---- tiling / split plan --------------------------------------------------
    target_rows = max(target_block_bytes // (_LANE_W * itemsize), _SUBLANES)
    tile_rows = min(_round_up(target_rows, _SUBLANES),
                    _round_up(pl.cdiv(rows, _NUM_SPLITS), _SUBLANES))
    n_real_tiles = pl.cdiv(rows, tile_rows)
    num_splits = _NUM_SPLITS if n_real_tiles >= _NUM_SPLITS else 1
    tiles_per_split = pl.cdiv(n_real_tiles, num_splits)
    has_skip = num_splits * tiles_per_split > n_real_tiles
    has_ragged = n_real_tiles * tile_rows * _LANE_W != total

    def _in_map(ci, ti):
        idx = ci * tiles_per_split + ti
        return (jnp.minimum(idx, n_real_tiles - 1), 0)   # clamp skipped tiles

    kernel = functools.partial(
        _focal_loss_kernel,
        tiles_per_split=tiles_per_split, tile_rows=tile_rows, lane_w=_LANE_W,
        n_real_tiles=n_real_tiles, full_rows=full_rows, rem=rem,
        has_ragged=has_ragged, has_skip=has_skip)

    cost = pl.CostEstimate(
        flops=12 * total,
        transcendentals=4 * total,   # exp + reciprocal (sigmoid), rsqrt, log
        bytes_accessed=(total * jnp.dtype(logits.dtype).itemsize
                        + total * jnp.dtype(target.dtype).itemsize
                        + num_splits * _SUBLANES * _LANE_W * 4),
    )

    partials = pl.pallas_call(
        kernel,
        out_shape=jax.ShapeDtypeStruct((num_splits * _SUBLANES, _LANE_W),
                                       jnp.float32),
        grid_spec=pltpu.PrefetchScalarGridSpec(
            num_scalar_prefetch=0,
            grid=(num_splits, tiles_per_split),
            in_specs=[
                pl.BlockSpec((tile_rows, _LANE_W), _in_map),
                pl.BlockSpec((tile_rows, _LANE_W), _in_map),
            ],
            out_specs=pl.BlockSpec((_SUBLANES, _LANE_W), lambda ci, ti: (ci, 0)),
        ),
        compiler_params=pltpu.CompilerParams(
            dimension_semantics=("parallel", "arbitrary"),
            vmem_limit_bytes=48 * 1024 * 1024,    # v7x-safe (64 MiB physical)
        ),
        cost_estimate=cost,
    )(x2d, t2d)

    return jnp.sum(partials) / jnp.float32(total)


def focal_loss_adaptive_ref(logits: jax.Array, target: jax.Array) -> jax.Array:
    """Pure-JAX reference mirroring the PyTorch module literally."""
    x = logits.astype(jnp.float32)
    t = target.astype(jnp.float32)
    p = jax.nn.sigmoid(x)
    pt = jnp.where(t == 1.0, p, 1.0 - p)
    pt = jnp.clip(pt, 0.001, 0.999)
    gamma = jnp.where(pt > 0.2, 0.5, 1.0)
    loss = -((1.0 - pt) ** gamma) * jnp.log(pt)
    return jnp.mean(loss)


if __name__ == "__main__":
    key = jax.random.PRNGKey(0)

    # Three small configs exercising: (a) lane-aligned clean path with 2-way
    # split, (b) pad + ragged-tile mask path, (c) multi-tile-per-split with a
    # clamped/skipped grid point (tiny block override) + f32 inputs.
    configs = [
        (384, 128, jnp.bfloat16, _TARGET_BLOCK_BYTES),
        (300, 40, jnp.bfloat16, _TARGET_BLOCK_BYTES),
        (300, 40, jnp.float32, 8 * 1024),
    ]

    for idx, (N, C, dt, tbb) in enumerate(configs):
        kx, kt = jax.random.split(jax.random.fold_in(key, idx))
        logits = (jax.random.normal(kx, (N, C), dtype=jnp.float32) * 2.0).astype(dt)
        target = jax.random.bernoulli(kt, p=0.3, shape=(N, C)).astype(dt)

        out = jax.block_until_ready(
            focal_loss_adaptive(logits, target, target_block_bytes=tbb))
        ref = focal_loss_adaptive_ref(logits, target)
        assert jnp.allclose(out, ref, rtol=1e-4, atol=1e-5), (idx, out, ref)

    print("KERNEL_OK")
</pallas_src>

<mosaic_0001>
module attributes {stable_mosaic.version = 11 : i64} {
  func.func @_focal_loss_kernel(%arg0: i32, %arg1: i32, %arg2: memref<48x512xbf16, #tpu.memory_space<vmem>>, %arg3: memref<48x512xbf16, #tpu.memory_space<vmem>>, %arg4: memref<8x512xf32, #tpu.memory_space<vmem>>) attributes {dimension_semantics = [#tpu.dimension_semantics<parallel>, #tpu.dimension_semantics<arbitrary>], iteration_bounds = array<i64: 2, 1>, scalar_prefetch = 0 : i64, scratch_operands = 0 : i64, tpu.core_type = #tpu.core_type<tc>, window_params = [{transform_indices = @transform_0, window_bounds = array<i64: 48, 512>}, {transform_indices = @transform_1, window_bounds = array<i64: 48, 512>}, {transform_indices = @transform_2, window_bounds = array<i64: 8, 512>}]} {
    %c0_i32 = arith.constant 0 : i32
    %0 = arith.cmpi eq, %arg1, %c0_i32 : i32
    %1 = arith.extui %0 : i1 to i32
    %c0_i32_0 = arith.constant 0 : i32
    %2 = arith.cmpi ne, %1, %c0_i32_0 : i32
    scf.if %2 {
      %cst_16 = arith.constant 0.000000e+00 : f32
      %37 = vector.broadcast %cst_16 : f32 to vector<8x512xf32>
      %c0_17 = arith.constant 0 : index
      %c0_18 = arith.constant 0 : index
      %38 = vector.load %arg4[%c0_17, %c0_18] : memref<8x512xf32, #tpu.memory_space<vmem>>, vector<8x512xf32>
      tpu.vector_store %arg4[%c0_17, %c0_18], %37 {strides = array<i32>} : memref<8x512xf32, #tpu.memory_space<vmem>>, vector<8x512xf32>,
    } else {
    }
    %c0 = arith.constant 0 : index
    %c0_1 = arith.constant 0 : index
    %3 = vector.load %arg2[%c0, %c0_1] : memref<48x512xbf16, #tpu.memory_space<vmem>>, vector<48x512xbf16>
    %4 = arith.extf %3 : vector<48x512xbf16> to vector<48x512xf32>
    %c0_2 = arith.constant 0 : index
    %c0_3 = arith.constant 0 : index
    %5 = vector.load %arg3[%c0_2, %c0_3] : memref<48x512xbf16, #tpu.memory_space<vmem>>, vector<48x512xbf16>
    %6 = arith.extf %5 : vector<48x512xbf16> to vector<48x512xf32>
    %cst = arith.constant 1.000000e+00 : f32
    %7 = vector.broadcast %cst : f32 to vector<48x512xf32>
    %8 = arith.cmpf oeq, %6, %7 : vector<48x512xf32>
    %cst_4 = arith.constant 0.000000e+00 : f32
    %9 = vector.broadcast %cst_4 : f32 to vector<48x512xf32>
    %10 = arith.subf %9, %4 : vector<48x512xf32>
    %11 = arith.select %8, %4, %10 : vector<48x512xi1>, vector<48x512xf32>
    %12 = arith.negf %11 : vector<48x512xf32>
    %13 = math.exp %12 : vector<48x512xf32>
    %cst_5 = arith.constant 1.000000e+00 : f32
    %14 = vector.broadcast %cst_5 : f32 to vector<48x512xf32>
    %15 = arith.addf %14, %13 : vector<48x512xf32>
    %16 = arith.divf %14, %15 : vector<48x512xf32>
    %cst_6 = arith.constant 1.000000e-03 : f32
    %cst_7 = arith.constant 9.990000e-01 : f32
    %17 = vector.broadcast %cst_6 : f32 to vector<48x512xf32>
    %18 = arith.maximumf %17, %16 : vector<48x512xf32>
    %19 = vector.broadcast %cst_7 : f32 to vector<48x512xf32>
    %20 = arith.minimumf %19, %18 : vector<48x512xf32>
    %cst_8 = arith.constant 1.000000e+00 : f32
    %21 = vector.broadcast %cst_8 : f32 to vector<48x512xf32>
    %22 = arith.subf %21, %20 : vector<48x512xf32>
    %cst_9 = arith.constant 2.000000e-01 : f32
    %23 = vector.broadcast %cst_9 : f32 to vector<48x512xf32>
    %24 = arith.cmpf ogt, %20, %23 : vector<48x512xf32>
    %25 = math.rsqrt %22 : vector<48x512xf32>
    %26 = arith.mulf %22, %25 : vector<48x512xf32>
    %27 = arith.select %24, %26, %22 : vector<48x512xi1>, vector<48x512xf32>
    %cst_10 = arith.constant 0.000000e+00 : f32
    %28 = vector.broadcast %cst_10 : f32 to vector<48x512xf32>
    %29 = arith.subf %28, %27 : vector<48x512xf32>
    %30 = math.log %20 : vector<48x512xf32>
    %31 = arith.mulf %29, %30 : vector<48x512xf32>
    %c0_11 = arith.constant 0 : index
    %c0_12 = arith.constant 0 : index
    %32 = vector.load %arg4[%c0_11, %c0_12] : memref<8x512xf32, #tpu.memory_space<vmem>>, vector<8x512xf32>
    %33 = vector.shape_cast %31 : vector<48x512xf32> to vector<6x8x512xf32>
    %cst_13 = arith.constant dense<0.000000e+00> : vector<8x512xf32>
    %34 = vector.multi_reduction <add>, %33, %cst_13 [0] : vector<6x8x512xf32> to vector<8x512xf32>
    %35 = arith.addf %32, %34 : vector<8x512xf32>
    %c0_14 = arith.constant 0 : index
    %c0_15 = arith.constant 0 : index
    %36 = vector.load %arg4[%c0_14, %c0_15] : memref<8x512xf32, #tpu.memory_space<vmem>>, vector<8x512xf32>
    tpu.vector_store %arg4[%c0_14, %c0_15], %35 {strides = array<i32>} : memref<8x512xf32, #tpu.memory_space<vmem>>, vector<8x512xf32>,
    return
  }
  func.func @transform_0(%arg0: i32, %arg1: i32) -> (i32, i32) {
    %c1_i32 = arith.constant 1 : i32
    %0 = arith.muli %arg0, %c1_i32 : i32
    %1 = arith.addi %0, %arg1 : i32
    %c1_i32_0 = arith.constant 1 : i32
    %2 = arith.minsi %1, %c1_i32_0 : i32
    %c0_i32 = arith.constant 0 : i32
    %c0_i32_1 = arith.constant 0 : i32
    return %2, %c0_i32 : i32, i32
  }
  func.func @transform_1(%arg0: i32, %arg1: i32) -> (i32, i32) {
    %c1_i32 = arith.constant 1 : i32
    %0 = arith.muli %arg0, %c1_i32 : i32
    %1 = arith.addi %0, %arg1 : i32
    %c1_i32_0 = arith.constant 1 : i32
    %2 = arith.minsi %1, %c1_i32_0 : i32
    %c0_i32 = arith.constant 0 : i32
    %c0_i32_1 = arith.constant 0 : i32
    return %2, %c0_i32 : i32, i32
  }
  func.func @transform_2(%arg0: i32, %arg1: i32) -> (i32, i32) {
    %c0_i32 = arith.constant 0 : i32
    %c0_i32_0 = arith.constant 0 : i32
    return %arg0, %c0_i32 : i32, i32
  }
}

</mosaic_0001>

<bundles_post_ra>
// kernel: tpu_custom_call.1
= control target key start
LH: loop header
LB: loop body
LE: loop exit
PB: predicated region body
PF: predicated region fallthrough
CT: control target
= control target key end

     0   :  { %s4240_s0 = inlined_call_operand.hbm [shape: bf16[96,512], index: 0, kind: input, shape index: {}]   ;;  %s4241_s1 = inlined_call_operand.hbm [shape: bf16[96,512], index: 1, kind: input, shape index: {}]   ;;  %s4242_s2 = inlined_call_operand.hbm [shape: f32[16,512], index: 2, kind: output, shape index: {}]  }
   0x1   :  { %4343 = sst [smem:[#allocation70_spill]] %s4240_s0 }
   0x2   :  { %7 = vsyncpa [#allocation3], 0 }
   0x3   :  { %9 = vsyncpa [#allocation3 + $0x1], 0 }
   0x4   :  { %10 = vsyncpa [#allocation6], 0 }
   0x5   :  { %12 = vsyncpa [#allocation6 + $0x1], 0 }
   0x6   :  { %13 = vsyncpa [#allocation4], 0 }
   0x7   :  { %15 = vsyncpa [#allocation4 + $0x1], 0  ;;  %s2008_s9 = smov 0   ;;  %s2010_s10 = smov 0  }
   0x8   :  { %s2012_s11 = smov 0   ;;  %s2014_s12 = smov 0  }
   0x9   :  { %s2016_s13 = smov 0   ;;  %s2018_s14 = smov 0  }
   0xa   :  { %s2020_s15 = smov 0   ;;  %s2022_s16 = smov 0  }
   0xb   :  { %s2024_s17 = smov 0  }
   0xc LB: > { %4344 = sst [smem:[#allocation11_spill]] %s1985_s16  ;;  %s1484_s18 = sadd.s32 4294967295, %s1989_s17   ;;  %s1989_s17 = sphi %s2024_s17, %s21_s17   ;;  %s1985_s16 = sphi %s2022_s16, %s4767_s16   ;;  %s1981_s15 = sphi %s2020_s15, %s4766_s15   ;;  %s1977_s14 = sphi %s2018_s14, %s4773_s14   ;;  %s1973_s13 = sphi %s2016_s13, %s4772_s13   ;;  %s1969_s12 = sphi %s2014_s12, %s4771_s12   ;;  %s1965_s11 = sphi %s2012_s11, %s4770_s11   ;;  %s1961_s10 = sphi %s2010_s10, %s4769_s10   ;;  %s1957_s9 = sphi %s2008_s9, %s4768_s9  }
   0xd   : > { %s1485_s19 = sadd.s32 4294967294, %s1989_s17   ;;  %s33_s20 = sadd.s32 1, %s1985_s16 }
   0xe   : > { %p38_p0 = scmp.lt.s32.totalorder %s1985_s16, 1  ;;  %p35_p1 = scmp.ge.s32.totalorder %s33_s20, 2 }
   0xf   : > { %s46_s21 = sadd.s32 1, %s1977_s14  ;;  %p53_p2 = scmp.ne.s32.totalorder %s1977_s14, %s1973_s13 }
  0x10   : > { %s2057_s22 = scalar_select %p38_p0, %s1985_s16, 1 }
  0x11   : > { %s4775_s20 = smov (%p35_p1, %s33_s20), 0  ;;  %p54_p3 = scmp.eq.s32.totalorder %s1989_s17, 0 }
  0x12   : > { %4345 = sst [smem:[#allocation12_spill]] %s4775_s20  ;;  %p41_p4 = scmp.lt.s32.totalorder %s4775_s20, 1 }
  0x13   : > { %p59_p5 = scmp.ne.s32.totalorder %s1973_s13, %s1969_s12  ;;  %p2066_p6 = por %p54_p3, %p53_p2 }
  0x14   : > { %p60_p7 = scmp.eq.s32.totalorder %s1484_s18, 0  ;;  %s101_s26 = ssub.s32 %s1985_s16, %s4775_s20 }
  0x15   : > { %s42_s24 = scalar_select %p41_p4, %s4775_s20, 1 }
  0x16   : > { %p2071_p8 = por %p60_p7, %p59_p5  ;;  %p102_p9 = scmp.eq.s32.totalorder %s101_s26, 0 }
  0x17   : > { %s43_s27 = ssub.s32 %s2057_s22, %s42_s24  ;;  %s104_s28 = sadd.s32 1, %s1965_s11 }
  0x18   : > { %p44_p10 = scmp.eq.s32.totalorder %s43_s27, 0  ;;  %p114_p11 = scmp.ne.s32.totalorder %s1965_s11, %s1961_s10 }
  0x19   : > { %s2080_s29 = scalar_select %p102_p9, %s1965_s11, %s104_s28  }
  0x1a   : > { %s2083_s30 = scalar_select %p44_p10, %s1977_s14, %s46_s21  }
  0x1b   : > { %p115_p12 = scmp.eq.s32.totalorder %s1484_s18, 1  ;;  %p120_p13 = scmp.ne.s32.totalorder %s1961_s10, %s1957_s9 }
  0x1c   : > { %p121_p0 = scmp.eq.s32.totalorder %s1485_s19, 1  ;;  %p1487_p2 = scmp.ge.s32.totalorder %s1989_s17, 2 }
  0x1d   : > { %p2089_p1 = por %p115_p12, %p114_p11  ;;  %p1550_p4 = scmp.lt.s32.totalorder %s1989_s17, 2 }
  0x1e   : > { %p2094_p3 = por %p121_p0, %p120_p13  ;;  %s2100_s5 = sand.u32 1, %s1977_s14  }
  0x1f   : > { %s1528_s6 = smul.u32 96, %s2057_s22  ;;  %s4350_s0 = sld [smem:[#allocation70_spill]] }
  0x20   : > { %s1530_s7 = smul.u32 96, %s2100_s5  ;;  %p2109_p5 = pnand %p1550_p4, %p2066_p6 }
  0x21   : > { %s142_s27 = scalar_lea.sflag [#allocation3], %s2100_s5  ;;  %s1991_s22 = smov 256  }
  0x22   : > { %s145_s24 = scalar_lea.vmem [#allocation2], %s1530_s7  ;;  %s1992_s28 = smov 16  }
  0x23   : > { %s157_s26 = sshll.u32 %s145_s24, 4  ;;  %p1492_p7 = scmp.ge.s32.totalorder %s1989_s17, 1  ;;  %s158_s26 = int_to_ptr.vmem [resolvable:$true] %s157_s26 }
  0x24   : > { %p191_p9 = scmp.lt.s32.totalorder %s1989_s17, 3  ;;  %s180_s12 = scalar_lea.hbm %s4241_s1, %s1528_s6 }
  0x25   : > { %s154_s18 = scalar_lea.hbm %s4350_s0, %s1528_s6  ;;  %s181_s0 = sshll.u32 %s180_s12, 4  ;;  %s182_s0 = int_to_ptr.hbm [resolvable:$true] %s181_s0 }
  0x26   : > { %s155_s21 = sshll.u32 %s154_s18, 4  ;;  %p192_p10 = pnand %p1492_p7, %p191_p9  ;;  %s156_s21 = int_to_ptr.hbm [resolvable:$true] %s155_s21 }
  0x27   : > { %1542 = dma.hbm_to_vmem [thread:$0]  (!%p2109_p5), %s156_s21, 1536, %s158_s26, %s142_s27, %s1991_s22, %s1991_s22, %s1992_s28  }
  0x28   : > { %s171_s18 = scalar_lea.vmem [#allocation5], %s1530_s7  ;;  %s168_s24 = scalar_lea.sflag [#allocation6], %s2100_s5 }
  0x29   : > { %s183_s20 = sshll.u32 %s171_s18, 4  ;;  %195 = sbr.rel (%p192_p10) target bundleno = 314 (0x13a), region = 28  ;;  %s184_s20 = int_to_ptr.vmem [resolvable:$true] %s183_s20 }
  0x2a   : > { %1545 = dma.hbm_to_vmem [thread:$0]  (!%p2109_p5), %s182_s0, 1536, %s184_s20, %s168_s24, %s1991_s22, %s1991_s22, %s1992_s28  }
  0x2e   : > { %s197_s16 = sand.u32 1, %s1973_s13  }
  0x2f   : > { %s1532_s21 = smul.u32 96, %s197_s16  ;;  %s198_s26 = scalar_lea.sflag [#allocation3], %s197_s16 }
  0x31   : > { %s201_s27 = scalar_lea.vmem [#allocation2], %s1532_s21 }
  0x32   : > { %1944 = dma.done.wait (%p2071_p8), %s198_s26, 1536  }
  0x33   : > { %1946 = vsyncadd (%p2071_p8), %s198_s26, 4294965760  ;;  %s208_s6 = scalar_lea.sflag [#allocation6], %s197_s16  ;;  %s2129_s7 = scalar_lea.vmem [#allocation5], %s1532_s21 }
  0x34   : > { %1948 = dma.done.wait (%p2071_p8), %s208_s6, 1536  }
  0x35   : > { %1950 = vsyncadd (%p2071_p8), %s208_s6, 4294965760  ;;  %v2135_v0 = vld [vmem:[%s201_s27] sm:$0xff]  ;;  %v2137_v1 = vld [vmem:[%s201_s27 + $0x8] sm:$0xff]  ;;  %s235_s0 = sand.u32 1, %s1961_s10   ;;  %s1527_s20 = sshll.u32 %s1981_s15, 5 }
  0x36   : > { %v2139_v2 = vld [vmem:[%s201_s27 + $0x10] sm:$0xff]  ;;  %v2141_v3 = vld [vmem:[%s201_s27 + $0x18] sm:$0xff]  ;;  %v2143_v4 = vld [vmem:[%s201_s27 + $0x20] sm:$0xff]  ;;  %v266_v7 = vunpack.c.l.bf16 %v2135_v0  ;;  %v267_v10 = vunpack.c.h.bf16 %v2135_v0  ;;  %v268_v11 = vunpack.c.l.bf16 %v2137_v1  ;;  %v269_v12 = vunpack.c.h.bf16 %v2137_v1  ;;  %s1493_s16 = sshll.u32 %s235_s0, 5  ;;  %s1378_s19 = scalar_lea.hbm %s4242_s2, %s1527_s20 }
  0x37   : > { %v2145_v5 = vld [vmem:[%s201_s27 + $0x28] sm:$0xff]  ;;  %v2147_v6 = vld [vmem:[%s201_s27 + $0x30] sm:$0xff]  ;;  %v2150_v8 = vld [vmem:[%s201_s27 + $0x38] sm:$0xff]  ;;  %v270_v13 = vunpack.c.l.bf16 %v2139_v2  ;;  %v271_v16 = vunpack.c.h.bf16 %v2139_v2  ;;  %v272_v17 = vunpack.c.l.bf16 %v2141_v3  ;;  %v273_v18 = vunpack.c.h.bf16 %v2141_v3  ;;  %s237_s15 = scalar_lea.vmem [#allocation7], %s1493_s16  ;;  %s1382_s28 = sshll.u32 %s1378_s19, 4  ;;  %s1383_s28 = int_to_ptr.hbm [resolvable:$true] %s1382_s28 }
  0x38   : > { %v2152_v9 = vld [vmem:[%s201_s27 + $0x40] sm:$0xff]  ;;  %v2158_v14 = vld [vmem:[%s201_s27 + $0x48] sm:$0xff]  ;;  %v2160_v15 = vld [vmem:[%s201_s27 + $0x50] sm:$0xff]  ;;  %v274_v19 = vunpack.c.l.bf16 %v2143_v4  ;;  %v275_v21 = vunpack.c.h.bf16 %v2143_v4  ;;  %v276_v22 = vunpack.c.l.bf16 %v2145_v5  ;;  %v277_v23 = vunpack.c.h.bf16 %v2145_v5  ;;  %s1380_s22 = sshll.u32 %s237_s15, 4  ;;  %s1367_s23 = scalar_lea.sflag [#allocation4], %s235_s0  ;;  %s1381_s22 = int_to_ptr.vmem [resolvable:$true] %s1380_s22 }
  0x39   : > { %v2166_v20 = vld [vmem:[%s201_s27 + $0x58] sm:$0xff]  ;;  %v278_v24 = vunpack.c.l.bf16 %v2147_v6  ;;  %v290_v25 = vld [vmem:[%s2129_s7] sm:$0xff]  ;;  %v279_v26 = vunpack.c.h.bf16 %v2147_v6  ;;  %v280_v27 = vunpack.c.l.bf16 %v2150_v8  ;;  %v281_v28 = vunpack.c.h.bf16 %v2150_v8  ;;  %v291_v30 = vld [vmem:[%s2129_s7 + $0x8] sm:$0xff]  ;;  %s1893_s8 = sshra.s32 %s1383_s28, 4  ;;  %s1899_s21 = scalar_lea.hbm %s4242_s2, 64  ;;  %s1894_s8 = int_to_ptr.hbm [resolvable:$true] %s1893_s8 }
  0x3a   : > { %v282_v29 = vunpack.c.l.bf16 %v2152_v9  ;;  %v292_v31 = vld [vmem:[%s2129_s7 + $0x10] sm:$0xff]  ;;  %v283_v32 = vunpack.c.h.bf16 %v2152_v9  ;;  %v284_v33 = vunpack.c.l.bf16 %v2158_v14  ;;  %v285_v34 = vunpack.c.h.bf16 %v2158_v14  ;;  %v293_v36 = vld [vmem:[%s2129_s7 + $0x18] sm:$0xff]  ;;  %v294_v37 = vld [vmem:[%s2129_s7 + $0x20] sm:$0xff]  ;;  %s1895_s12 = scalar_lea.hbm %s1894_s8, 32  ;;  %p1900_p12 = scmp.lt.s32.totalorder %s1894_s8, %s4242_s2 }
  0x3b   : > { %v295_v41 = vld [vmem:[%s2129_s7 + $0x28] sm:$0xff]  ;;  %v296_v42 = vld [vmem:[%s2129_s7 + $0x30] sm:$0xff]  ;;  %v302_v43 = vunpack.c.l.bf16 %v290_v25  ;;  %v297_v44 = vld [vmem:[%s2129_s7 + $0x38] sm:$0xff]  ;;  %v303_v46 = vunpack.c.h.bf16 %v290_v25  ;;  %v304_v47 = vunpack.c.l.bf16 %v291_v30  ;;  %v305_v48 = vunpack.c.h.bf16 %v291_v30  ;;  %p1896_p6 = scmp.ne.s32.totalorder %s1894_s8, %s1895_s12  ;;  %p1901_p13 = scmp.lt.s32.totalorder %s1899_s21, %s1895_s12 }
  0x3c   : > { %v298_v45 = vld [vmem:[%s2129_s7 + $0x40] sm:$0xff]  ;;  %v306_v49 = vunpack.c.l.bf16 %v292_v31  ;;  %v2193_v50 = vld [vmem:[%s2129_s7 + $0x48] sm:$0xff]  ;;  %v307_v51 = vunpack.c.h.bf16 %v292_v31  ;;  %v308_v52 = vunpack.c.l.bf16 %v293_v36  ;;  %v309_v53 = vunpack.c.h.bf16 %v293_v36  ;;  %v2196_v55 = vld [vmem:[%s2129_s7 + $0x50] sm:$0xff] }
  0x3d   : > { %v310_v54 = vunpack.c.l.bf16 %v294_v37  ;;  %v311_v56 = vunpack.c.h.bf16 %v294_v37  ;;  %v312_v57 = vunpack.c.l.bf16 %v295_v41  ;;  %v313_v58 = vunpack.c.h.bf16 %v295_v41  ;;  %p1897_p8 = pnand %p1896_p6, %p2089_p1  ;;  %p1902_p0 = por %p1901_p13, %p1900_p12 }
  0x3e   : > { %v314_v59 = vunpack.c.l.bf16 %v296_v42  ;;  %v315_v60 = vunpack.c.h.bf16 %v296_v42  ;;  %v316_v61 = vunpack.c.l.bf16 %v297_v44  ;;  %v317_v62 = vunpack.c.h.bf16 %v297_v44 }
  0x3f   : > { %v318_v63 = vunpack.c.l.bf16 %v298_v45  ;;  %v319_v25 = vunpack.c.h.bf16 %v298_v45  ;;  %v320_v30 = vunpack.c.l.bf16 %v2193_v50  ;;  %v321_v40 = vunpack.c.h.bf16 %v2193_v50  ;;  %p1898_p11 = pneg %p1897_p8 }
  0x40   : > { %v350_v31 = vsub.f32 0.0, %v266_v7  ;;  %vm326_vm0 = vcmp.eq.f32.partialorder %v302_v43, 1.0  ;;  %vm2203_vm1 = vcmp.eq.f32.partialorder %v303_v46, 1.0  ;;  %v351_v41 = vsub.f32 0.0, %v267_v10 }
  0x41   : > { %vm2209_vm2 = vcmp.eq.f32.partialorder %v304_v47, 1.0  ;;  %vm2213_vm3 = vcmp.eq.f32.partialorder %v305_v48, 1.0  ;;  %vm2217_vm4 = vcmp.eq.f32.partialorder %v306_v49, 1.0  ;;  %v352_v43 = vsub.f32 0.0, %v268_v11  ;;  %p1903_p4 = pnand %p1902_p0, %p1898_p11 }
  0x42   : > { %vm2223_vm5 = vcmp.eq.f32.partialorder %v307_v51, 1.0  ;;  %vm2227_vm6 = vcmp.eq.f32.partialorder %v308_v52, 1.0  ;;  %vm2231_vm7 = vcmp.eq.f32.partialorder %v309_v53, 1.0  ;;  %v353_v49 = vsub.f32 0.0, %v269_v12 }
  0x43   : > { %vm2237_vm8 = vcmp.eq.f32.partialorder %v310_v54, 1.0  ;;  %vm2241_vm9 = vcmp.eq.f32.partialorder %v311_v56, 1.0  ;;  %v354_v52 = vsub.f32 0.0, %v270_v13  ;;  %v374_v53 = vsel %vm326_vm0, %v266_v7, %v350_v31 }
  0x44   : > { %vm2249_vm10 = vcmp.eq.f32.partialorder %v312_v57, 1.0  ;;  %vm2253_vm11 = vcmp.eq.f32.partialorder %v313_v58, 1.0  ;;  %v355_v54 = vsub.f32 0.0, %v271_v16  ;;  %v375_v56 = vsel %vm2203_vm1, %v267_v10, %v351_v41 }
  0x45   : > { %vm2263_vm12 = vcmp.eq.f32.partialorder %v314_v59, 1.0  ;;  %vm2267_vm13 = vcmp.eq.f32.partialorder %v315_v60, 1.0  ;;  %v356_v57 = vsub.f32 0.0, %v272_v17  ;;  %v376_v58 = vsel %vm2209_vm2, %v268_v11, %v352_v43 }
  0x46   : > { %vm2277_vm14 = vcmp.eq.f32.partialorder %v316_v61, 1.0  ;;  %v357_v10 = vsub.f32 0.0, %v273_v18  ;;  %v377_v59 = vsel %vm2213_vm3, %v269_v12, %v353_v49  ;;  %v1494_v60 = vmul.f32 -1.442695, %v374_v53 }
  0x47   : > { %vm2287_vm15 = vcmp.eq.f32.partialorder %v317_v62, 1.0  ;;  %v358_v11 = vsub.f32 0.0, %v274_v19  ;;  %v378_v61 = vsel %vm2217_vm4, %v270_v13, %v354_v52  ;;  %v1495_v37 = vmul.f32 -1.442695, %v375_v56 }
  0x48   : > { %vm2297_vm0 = vcmp.eq.f32.partialorder %v318_v63, 1.0  ;;  %v359_v1 = vsub.f32 0.0, %v275_v21  ;;  %v379_v12 = vsel %vm2223_vm5, %v271_v16, %v355_v54  ;;  %v1496_v62 = vmul.f32 -1.442695, %v376_v58 }
  0x49   : > { %vm2307_vm1 = vcmp.eq.f32.partialorder %v319_v25, 1.0  ;;  %v360_v13 = vsub.f32 0.0, %v276_v22  ;;  %v380_v63 = vsel %vm2227_vm6, %v272_v17, %v356_v57  ;;  %v1497_v44 = vmul.f32 -1.442695, %v377_v59  ;;  %v301_v57 = vld [vmem:[%s2129_s7 + $0x58] sm:$0xff] }
  0x4a   : > { %v361_v2 = vsub.f32 0.0, %v277_v23  ;;  %v381_v16 = vsel %vm2231_vm7, %v273_v18, %v357_v10  ;;  %1627 = vpow2.f32 %v1494_v60  ;;  %v1498_v25 = vmul.f32 -1.442695, %v378_v61 }
  0x4b   : > { %v362_v45 = vsub.f32 0.0, %v278_v24  ;;  %v382_v43 = vsel %vm2237_vm8, %v274_v19, %v358_v11  ;;  %1629 = vpow2.f32 %v1495_v37  ;;  %v1499_v17 = vmul.f32 -1.442695, %v379_v12 }
  0x4c   : > { %v363_v46 = vsub.f32 0.0, %v279_v26  ;;  %v383_v3 = vsel %vm2241_vm9, %v275_v21, %v359_v1  ;;  %1631 = vpow2.f32 %v1496_v62  ;;  %v1500_v18 = vmul.f32 -1.442695, %v380_v63 }
  0x4d   : > { %v364_v47 = vsub.f32 0.0, %v280_v27  ;;  %v384_v19 = vsel %vm2249_vm10, %v276_v22, %v360_v13  ;;  %1633 = vpow2.f32 %v1497_v44  ;;  %v1501_v39 = vmul.f32 -1.442695, %v381_v16 }
  0x4e   : > { %v365_v48 = vsub.f32 0.0, %v281_v28  ;;  %v385_v4 = vsel %vm2253_vm11, %v277_v23, %v361_v2  ;;  %1635 = vpow2.f32 %v1498_v25  ;;  %v1502_v21 = vmul.f32 -1.442695, %v382_v43 }
  0x4f   : > { %v366_v49 = vsub.f32 0.0, %v282_v29  ;;  %v386_v22 = vsel %vm2263_vm12, %v278_v24, %v362_v45  ;;  %1637 = vpow2.f32 %v1499_v17  ;;  %v1503_v38 = vmul.f32 -1.442695, %v383_v3 }
  0x50   : > { %v1628_v51 = vpop.eup %1627  ;;  %v367_v5 = vsub.f32 0.0, %v283_v32  ;;  %v387_v23 = vsel %vm2267_vm13, %v279_v26, %v363_v46  ;;  %1639 = vpow2.f32 %v1500_v18  ;;  %v1504_v35 = vmul.f32 -1.442695, %v384_v19 }
  0x51   : > { %v1630_v52 = vpop.eup %1629  ;;  %v368_v53 = vsub.f32 0.0, %v284_v33  ;;  %v388_v24 = vsel %vm2277_vm14, %v280_v27, %v364_v47  ;;  %1641 = vpow2.f32 %v1501_v39  ;;  %v1505_v36 = vmul.f32 -1.442695, %v385_v4 }
  0x52   : > { %v1632_v54 = vpop.eup %1631  ;;  %vm2367_vm2 = vcmp.eq.f32.partialorder %v320_v30, 1.0  ;;  %v389_v26 = vsel %vm2287_vm15, %v281_v28, %v365_v48  ;;  %1643 = vpow2.f32 %v1502_v21  ;;  %v1506_v56 = vmul.f32 -1.442695, %v386_v22 }
  0x53   : > { %v1634_v7 = vpop.eup %1633  ;;  %v323_v27 = vunpack.c.h.bf16 %v2196_v55  ;;  %v390_v58 = vsel %vm2297_vm0, %v282_v29, %v366_v49  ;;  %1645 = vpow2.f32 %v1503_v38  ;;  %v1507_v30 = vmul.f32 -1.442695, %v387_v23 }
  0x54   : > { %v1636_v0 = vpop.eup %1635  ;;  %v369_v8 = vsub.f32 0.0, %v285_v34  ;;  %v391_v28 = vsel %vm2307_vm1, %v283_v32, %v367_v5  ;;  %1647 = vpow2.f32 %v1504_v35  ;;  %v1508_v10 = vmul.f32 -1.442695, %v388_v24 }
  0x55   : > { %v1638_v59 = vpop.eup %1637  ;;  %vm2389_vm3 = vcmp.eq.f32.partialorder %v321_v40, 1.0  ;;  %v392_v29 = vsel %vm2367_vm2, %v284_v33, %v368_v53  ;;  %1649 = vpow2.f32 %v1505_v36  ;;  %v1509_v31 = vmul.f32 -1.442695, %v389_v26 }
  0x56   : > { %v1640_v9 = vpop.eup %1639  ;;  %v324_v11 = vunpack.c.l.bf16 %v301_v57  ;;  %v325_v61 = vunpack.c.h.bf16 %v301_v57  ;;  %1651 = vpow2.f32 %v1506_v56  ;;  %v1510_v32 = vmul.f32 -1.442695, %v390_v58 }
  0x57   : > { %v1642_v37 = vpop.eup %1641  ;;  %v4390_v41 = vunpack.c.l.bf16 %v2196_v55  ;;  %vm2403_vm5 = vcmp.eq.f32.partialorder %v323_v27, 1.0  ;;  %1653 = vpow2.f32 %v1507_v30  ;;  %v1511_v33 = vmul.f32 -1.442695, %v391_v28 }
  0x58   : > { %v1644_v1 = vpop.eup %1643  ;;  %v4395_v12 = vunpack.c.l.bf16 %v2160_v15  ;;  %v393_v42 = vsel %vm2389_vm3, %v285_v34, %v369_v8  ;;  %1655 = vpow2.f32 %v1508_v10  ;;  %v1512_v55 = vmul.f32 -1.442695, %v392_v29 }
  0x59   : > { %vm2399_vm4 = vcmp.eq.f32.partialorder %v4390_v41, 1.0  ;;  %v1646_v13 = vpop.eup %1645  ;;  %v4396_v63 = vunpack.c.h.bf16 %v2160_v15  ;;  %v4397_v2 = vunpack.c.l.bf16 %v2166_v20  ;;  %1657 = vpow2.f32 %v1509_v31 }
  0x5a   : > { %v370_v62 = vsub.f32 0.0, %v4395_v12  ;;  %v2417_v25 = vadd.f32 1.0, %v1628_v51  ;;  %v1648_v45 = vpop.eup %1647  ;;  %vm348_vm6 = vcmp.eq.f32.partialorder %v324_v11, 1.0  ;;  %v4398_v43 = vunpack.c.h.bf16 %v2166_v20 }
  0x5b   : > { %v371_v44 = vsub.f32 0.0, %v4396_v63  ;;  %v372_v16 = vsub.f32 0.0, %v4397_v2  ;;  %1659 = vpow2.f32 %v1510_v32  ;;  %v2421_v17 = vadd.f32 1.0, %v1630_v52  ;;  %v1650_v34 = vpop.eup %1649 }
  0x5c   : > { %v373_v14 = vsub.f32 0.0, %v4398_v43  ;;  %vm349_vm7 = vcmp.eq.f32.partialorder %v325_v61, 1.0  ;;  %1661 = vpow2.f32 %v1511_v33  ;;  %v1513_v46 = vmul.f32 -1.442695, %v393_v42  ;;  %v1652_v3 = vpop.eup %1651 }
  0x5d   : > { %v4399_v18 = vmov %v4395_v12  ;;  %1663 = vpow2.f32 %v1512_v55  ;;  %v2427_v19 = vadd.f32 1.0, %v1632_v54  ;;  %v1654_v39 = vpop.eup %1653  ;;  %v4400_v48 = vmov %v4396_v63 }
  0x5e   : > { %v394_v47 = vsel %vm2399_vm4, %v4399_v18, %v370_v62  ;;  %v395_v4 = vsel %vm2403_vm5, %v4400_v48, %v371_v44  ;;  %v4401_v21 = vmov %v4397_v2  ;;  %v2435_v22 = vadd.f32 1.0, %v1634_v7  ;;  %v1656_v38 = vpop.eup %1655 }
  0x5f   : > { %v396_v49 = vsel %vm348_vm6, %v4401_v21, %v372_v16  ;;  %1665 = vrcp.f32 %v2417_v25  ;;  %v4402_v51 = vmov %v4398_v43  ;;  %v2440_v23 = vadd.f32 1.0, %v1636_v0  ;;  %v1658_v15 = vpop.eup %1657 }
  0x60   : > { %v397_v5 = vsel %vm349_vm7, %v4402_v51, %v373_v14  ;;  %v505_v35 = vand.u32 2147483648, %v2417_v25  ;;  %1667 = vrcp.f32 %v2421_v17  ;;  %v1514_v52 = vmul.f32 -1.442695, %v394_v47 }
  0x61   : > { %1669 = vpow2.f32 %v1513_v46  ;;  %v2444_v53 = vadd.f32 1.0, %v1638_v59  ;;  %v520_v24 = vand.u32 2147483648, %v2421_v17  ;;  %v1660_v36 = vpop.eup %1659  ;;  %v1515_v54 = vmul.f32 -1.442695, %v395_v4 }
  0x62   : > { %v1516_v6 = vmul.f32 -1.442695, %v396_v49  ;;  %v2447_v26 = vadd.f32 1.0, %v1640_v9  ;;  %1671 = vrcp.f32 %v2427_v19  ;;  %v1662_v20 = vpop.eup %1661  ;;  %v1517_v56 = vmul.f32 -1.442695, %v397_v5 }
  0x63   : > { %v503_v7 = vand.u32 2147483647, %v2417_v25  ;;  %v535_v57 = vand.u32 2147483648, %v2427_v19  ;;  %1673 = vrcp.f32 %v2435_v22  ;;  %v1664_v27 = vpop.eup %1663  ;;  %v2453_v58 = vor.u32 1.1754944e-38, %v505_v35 }
  0x64   : > { %v518_v30 = vand.u32 2147483647, %v2421_v17  ;;  %v550_v0 = vand.u32 2147483648, %v2435_v22  ;;  %1675 = vrcp.f32 %v2440_v23  ;;  %v2460_v28 = vadd.f32 1.0, %v1642_v37 }
  0x65   : > { %v2458_v8 = vpop.eup %1665  ;;  %v2462_v10 = vor.u32 1.1754944e-38, %v520_v24  ;;  %v533_v59 = vand.u32 2147483647, %v2427_v19  ;;  %1677 = vrcp.f32 %v2444_v53  ;;  %v2468_v29 = vadd.f32 1.0, %v1644_v1 }
  0x66   : > { %v2466_v60 = vpop.eup %1667  ;;  %v2470_v31 = vadd.f32 1.0, %v1646_v13  ;;  %v548_v9 = vand.u32 2147483647, %v2435_v22  ;;  %1679 = vrcp.f32 %v2447_v26  ;;  %v2474_v61 = vadd.f32 1.0, %v1648_v45 }
  0x67   : > { %v1670_v11 = vpop.eup %1669  ;;  %1681 = vpow2.f32 %v1514_v52  ;;  %v2476_v32 = vor.u32 1.1754944e-38, %v535_v57  ;;  %v565_v37 = vand.u32 2147483648, %v2440_v23  ;;  %v2481_v40 = vadd.f32 1.0, %v1650_v34 }
  0x68   : > { %v2479_v41 = vpop.eup %1671  ;;  %1683 = vpow2.f32 %v1515_v54  ;;  %v2483_v50 = vadd.f32 1.0, %v1652_v3  ;;  %v2485_v33 = vor.u32 1.1754944e-38, %v550_v0  ;;  %v495_v12 = vmul.f32 %v2458_v8, %v2417_v25 }
  0x69   : > { %v2487_v1 = vpop.eup %1673  ;;  %1685 = vpow2.f32 %v1516_v6  ;;  %v510_v62 = vmul.f32 %v2466_v60, %v2421_v17  ;;  %v563_v42 = vand.u32 2147483647, %v2440_v23  ;;  %v2496_v13 = vadd.f32 1.0, %v1654_v39 }
  0x6a   : > { %v2494_v55 = vpop.eup %1675  ;;  %1687 = vpow2.f32 %v1517_v56  ;;  %v2498_v63 = vadd.f32 1.0, %v1656_v38  ;;  %v580_v44 = vand.u32 2147483648, %v2444_v53  ;;  %v2503_v16 = vadd.f32 1.0, %v1658_v15 }
  0x6b   : > { %v2501_v2 = vpop.eup %1677  ;;  %vm499_vm8 = vweird.f32 %v2417_v25  ;;  %v2506_v45 = vor.u32 1.1754944e-38, %v565_v37  ;;  %v578_v43 = vand.u32 2147483647, %v2444_v53  ;;  %1689 = vrcp.f32 %v2460_v28 }
  0x6c   : > { %v2510_v14 = vpop.eup %1679  ;;  %v2512_v34 = vadd.f32 1.0, %v1660_v36  ;;  %v2514_v46 = vadd.f32 1.0, %v1662_v20  ;;  %vm514_vm9 = vweird.f32 %v2421_v17  ;;  %v595_v3 = vand.u32 2147483648, %v2447_v26 }
  0x6d   : > { %1691 = vrcp.f32 %v2468_v29  ;;  %v1682_v18 = vpop.eup %1681  ;;  %v496_v47 = vsub.f32 1.0, %v495_v12  ;;  %v511_v39 = vsub.f32 1.0, %v510_v62  ;;  %v525_v48 = vmul.f32 %v2479_v41, %v2427_v19 }
  0x6e   : > { %vm529_vm10 = vweird.f32 %v2427_v19  ;;  %1693 = vrcp.f32 %v2470_v31  ;;  %v1684_v4 = vpop.eup %1683  ;;  %v540_v21 = vmul.f32 %v2487_v1, %v2435_v22  ;;  %v555_v49 = vmul.f32 %v2494_v55, %v2440_v23 }
  0x6f   : > { %v2528_v38 = vor.u32 1.1754944e-38, %v580_v44  ;;  %v610_v51 = vand.u32 2147483648, %v2460_v28  ;;  %v1686_v5 = vpop.eup %1685  ;;  %v2531_v35 = vadd.f32 1.0, %v1664_v27  ;;  %v570_v15 = vmul.f32 %v2501_v2, %v2444_v53 }
  0x70   : > { %v585_v52 = vmul.f32 %v2510_v14, %v2447_v26  ;;  %v593_v24 = vand.u32 2147483647, %v2447_v26  ;;  %v1688_v36 = vpop.eup %1687  ;;  %v2539_v54 = vadd.f32 1.0, %v1670_v11  ;;  %v2541_v6 = vadd.f32 1.0, %v1682_v18 }
  0x71   : > { %v2544_v20 = vor.u32 1.1754944e-38, %v595_v3  ;;  %v2547_v57 = vpop.eup %1689  ;;  %v2549_v27 = vadd.f32 1.0, %v1684_v4  ;;  %v497_v0 = vmul.f32 %v2458_v8, %v496_v47  ;;  %vm2554_vm14 = vcmp.eq.f32.partialorder %v503_v7, 8.507059e+37 }
  0x72   : > { %v512_v11 = vmul.f32 %v2466_v60, %v511_v39  ;;  %v526_v12 = vsub.f32 1.0, %v525_v48  ;;  %v2562_v44 = vadd.f32 1.0, %v1686_v5  ;;  %vm2566_vm0 = vcmp.eq.f32.partialorder %v518_v30, 8.507059e+37 }
  0x73   : > { %v2560_v62 = vpop.eup %1691  ;;  %v541_v18 = vsub.f32 1.0, %v540_v21  ;;  %v556_v7 = vsub.f32 1.0, %v555_v49  ;;  %v2570_v47 = vor.u32 1.1754944e-38, %v610_v51  ;;  %vm500_vm1 = vweird.f32 %v2458_v8 }
  0x74   : > { %4405 = vst [vmem:[#allocation13_spill] sm:$0xff] %v2562_v44  ;;  %v2572_v4 = vpop.eup %1693  ;;  %v571_v39 = vsub.f32 1.0, %v570_v15  ;;  %v586_v48 = vsub.f32 1.0, %v585_v52  ;;  %v623_v56 = vand.u32 2147483647, %v2468_v29  ;;  %vm515_vm2 = vweird.f32 %v2466_v60  ;;  %vm2594_vm6 = vmor %vm499_vm8, %vm500_vm1 }
  0x75   : > { %vm530_vm3 = vweird.f32 %v2479_v41  ;;  %vm545_vm4 = vweird.f32 %v2487_v1  ;;  %v600_v30 = vmul.f32 %v2547_v57, %v2460_v28  ;;  %v498_v21 = vadd.f32 %v2458_v8, %v497_v0  ;;  %vm2622_vm1 = vmor %vm514_vm9, %vm515_vm2 }
  0x76   : > { %v513_v49 = vadd.f32 %v2466_v60, %v512_v11  ;;  %v527_v51 = vmul.f32 %v2479_v41, %v526_v12  ;;  %vm2586_vm5 = vcmp.eq.f32.partialorder %v533_v59, 8.507059e+37  ;;  %v615_v15 = vmul.f32 %v2560_v62, %v2468_v29  ;;  %vm2644_vm2 = vmor %vm529_vm10, %vm530_vm3 }
  0x77   : > { %v542_v0 = vmul.f32 %v2487_v1, %v541_v18  ;;  %vm2601_vm7 = vcmp.eq.f32.partialorder %v548_v9, 8.507059e+37  ;;  %v557_v59 = vmul.f32 %v2494_v55, %v556_v7  ;;  %vm2608_vm15 = vcmp.eq.f32.partialorder %v563_v42, 8.507059e+37 }
  0x78   : > { %v630_v25 = vmul.f32 %v2572_v4, %v2470_v31  ;;  %1695 = vrcp.f32 %v2474_v61  ;;  %v2616_v18 = vadd.f32 1.0, %v1688_v36  ;;  %v572_v42 = vmul.f32 %v2501_v2, %v571_v39 }
  0x79   : > { %vm2630_vm8 = vcmp.eq.f32.partialorder %v578_v43, 8.507059e+37  ;;  %v587_v36 = vmul.f32 %v2510_v14, %v586_v48  ;;  %vm2635_vm12 = vcmp.eq.f32.partialorder %v593_v24, 8.507059e+37  ;;  %vm575_vm13 = vweird.f32 %v2501_v2 }
  0x7a   : > { %4416 = vst [vmem:[#allocation14_spill] sm:$0xff] %v2616_v18  ;;  %v601_v43 = vsub.f32 1.0, %v600_v30  ;;  %v625_v24 = vand.u32 2147483648, %v2468_v29  ;;  %v502_v39 = vsel %vm2594_vm6, %v2458_v8, %v498_v21  ;;  %v528_v48 = vadd.f32 %v2479_v41, %v527_v51 }
  0x7b   : > { %vm4425_vm10 = vweird.f32 %v2435_v22  ;;  %v616_v44 = vsub.f32 1.0, %v615_v15  ;;  %1697 = vrcp.f32 %v2481_v40  ;;  %v517_v30 = vsel %vm2622_vm1, %v2466_v60, %v513_v49 }
  0x7c   : > { %vm2659_vm3 = vmor %vm4425_vm10, %vm545_vm4  ;;  %v543_v52 = vadd.f32 %v2487_v1, %v542_v0  ;;  %v558_v8 = vadd.f32 %v2494_v55, %v557_v59  ;;  %vm4428_vm6 = vweird.f32 %v2494_v55  ;;  %vm4429_vm9 = vweird.f32 %v2440_v23 }
  0x7d   : > { %vm2673_vm11 = vmor %vm4429_vm9, %vm4428_vm6  ;;  %v631_v21 = vsub.f32 1.0, %v630_v25  ;;  %v573_v51 = vadd.f32 %v2501_v2, %v572_v42  ;;  %vm4432_vm4 = vweird.f32 %v2444_v53  ;;  %v588_v49 = vadd.f32 %v2510_v14, %v587_v36 }
  0x7e   : > { %vm2682_vm1 = vmor %vm4432_vm4, %vm575_vm13  ;;  %vm634_vm10 = vweird.f32 %v2470_v31  ;;  %1699 = vrcp.f32 %v2483_v50  ;;  %v2689_v23 = vpop.eup %1695  ;;  %v2694_v15 = vsel %vm2554_vm14, %v2453_v58, %v502_v39  ;;  %vm4435_vm9 = vweird.f32 %v2510_v14 }
  0x7f   : > { %vm4436_vm13 = vweird.f32 %v2447_v26  ;;  %v602_v0 = vmul.f32 %v2547_v57, %v601_v43  ;;  %v4439_v59 = vand.u32 2147483647, %v2460_v28  ;;  %v626_v9 = vor.u32 1.1754944e-38, %v625_v24 }
  0x80   : > { %vm2700_vm6 = vmor %vm4436_vm13, %vm4435_vm9  ;;  %v638_v58 = vand.u32 2147483647, %v2470_v31  ;;  %v2715_v37 = vsel %vm2566_vm0, %v2462_v10, %v517_v30  ;;  %v532_v26 = vsel %vm2644_vm2, %v2479_v41, %v528_v48  ;;  %v617_v42 = vmul.f32 %v2560_v62, %v616_v44 }
  0x81   : > { %vm2707_vm4 = vcmp.eq.f32.partialorder %v4439_v59, 8.507059e+37  ;;  %1701 = vrcp.f32 %v2496_v13  ;;  %v547_v36 = vsel %vm2659_vm3, %v2487_v1, %v543_v52  ;;  %v562_v43 = vsel %vm2673_vm11, %v2494_v55, %v558_v8  ;;  %v2734_v3 = vpop.eup %1697 }
  0x82   : > { %vm605_vm14 = vweird.f32 %v2547_v57  ;;  %vm2729_vm0 = vcmp.eq.f32.partialorder %v623_v56, 8.507059e+37  ;;  %v632_v41 = vmul.f32 %v2572_v4, %v631_v21  ;;  %v577_v44 = vsel %vm2682_vm1, %v2501_v2, %v573_v51 }
  0x83   : > { %v592_v1 = vsel %vm2700_vm6, %v2510_v14, %v588_v49  ;;  %vm620_vm11 = vweird.f32 %v2560_v62  ;;  %v645_v55 = vmul.f32 %v2689_v23, %v2474_v61  ;;  %v2748_v56 = vsel %vm2586_vm5, %v2476_v32, %v532_v26 }
  0x84   : > { %v603_v17 = vadd.f32 %v2547_v57, %v602_v0  ;;  %vm635_vm2 = vweird.f32 %v2572_v4  ;;  %1703 = vrcp.f32 %v2498_v63  ;;  %v2753_v2 = vpop.eup %1699  ;;  %v2758_v14 = vsel %vm2601_vm7, %v2485_v33, %v547_v36 }
  0x85   : > { %v2763_v24 = vsel %vm2608_vm15, %v2506_v45, %v562_v43  ;;  %vm4444_vm5 = vweird.f32 %v2460_v28  ;;  %v618_v5 = vadd.f32 %v2560_v62, %v617_v42  ;;  %v640_v39 = vand.u32 2147483648, %v2470_v31 }
  0x86   : > { %vm2769_vm3 = vmor %vm4444_vm5, %vm605_vm14  ;;  %v2778_v33 = vsel %vm2630_vm8, %v2528_v38, %v577_v44  ;;  %v2783_v45 = vsel %vm2635_vm12, %v2544_v20, %v592_v1  ;;  %vm4447_vm15 = vweird.f32 %v2468_v29  ;;  %v633_v11 = vadd.f32 %v2572_v4, %v632_v41 }
  0x87   : > { %vm2787_vm7 = vmor %vm4447_vm15, %vm620_vm11  ;;  %v660_v12 = vmul.f32 %v2734_v3, %v2481_v40  ;;  %v2794_v48 = vpop.eup %1701  ;;  %vm2802_vm12 = vcmp.eq.f32.partialorder %v638_v58, 8.507059e+37  ;;  %v646_v29 = vsub.f32 1.0, %v645_v55  ;;  %v655_v18 = vand.u32 2147483648, %v2474_v61 }
  0x88   : > { %vm2798_vm8 = vmor %vm634_vm10, %vm635_vm2  ;;  %1705 = vrcp.f32 %v2503_v16  ;;  %v607_v7 = vsel %vm2769_vm3, %v2547_v57, %v603_v17  ;;  %vm649_vm1 = vweird.f32 %v2474_v61  ;;  %v653_v31 = vand.u32 2147483647, %v2474_v61 }
  0x89   : > { %v675_v19 = vmul.f32 %v2753_v2, %v2483_v50  ;;  %v622_v30 = vsel %vm2787_vm7, %v2560_v62, %v618_v5  ;;  %v641_v52 = vor.u32 1.1754944e-38, %v640_v39  ;;  %vm664_vm10 = vweird.f32 %v2481_v40 }
  0x8a   : > { %v668_v8 = vand.u32 2147483647, %v2481_v40  ;;  %v2820_v22 = vpop.eup %1703  ;;  %v637_v57 = vsel %vm2798_vm8, %v2572_v4, %v633_v11  ;;  %v661_v21 = vsub.f32 1.0, %v660_v12  ;;  %v670_v51 = vand.u32 2147483648, %v2481_v40 }
  0x8b   : > { %v690_v60 = vmul.f32 %v2794_v48, %v2496_v13  ;;  %v2831_v62 = vsel %vm2707_vm4, %v2570_v47, %v607_v7  ;;  %v647_v49 = vmul.f32 %v2689_v23, %v646_v29  ;;  %v656_v53 = vor.u32 1.1754944e-38, %v655_v18 }
  0x8c   : > { %1707 = vrcp.f32 %v2512_v34  ;;  %vm2835_vm9 = vcmp.eq.f32.partialorder %v653_v31, 8.507059e+37  ;;  %v676_v4 = vsub.f32 1.0, %v675_v19  ;;  %vm679_vm13 = vweird.f32 %v2483_v50 }
  0x8d   : > { %v683_v59 = vand.u32 2147483647, %v2483_v50  ;;  %v685_v58 = vand.u32 2147483648, %v2483_v50  ;;  %v2846_v47 = vsel %vm2729_vm0, %v626_v9, %v622_v30  ;;  %v2850_v25 = vsel %vm2802_vm12, %v641_v52, %v637_v57 }
  0x8e   : > { %v2842_v26 = vpop.eup %1705  ;;  %vm650_vm6 = vweird.f32 %v2689_v23  ;;  %v705_v42 = vmul.f32 %v2820_v22, %v2498_v63  ;;  %v662_v36 = vmul.f32 %v2734_v3, %v661_v21  ;;  %vm2856_vm4 = vcmp.eq.f32.partialorder %v668_v8, 8.507059e+37 }
  0x8f   : > { %v671_v41 = vor.u32 1.1754944e-38, %v670_v51  ;;  %v691_v44 = vsub.f32 1.0, %v690_v60  ;;  %v698_v9 = vand.u32 2147483647, %v2496_v13  ;;  %v648_v10 = vadd.f32 %v2689_v23, %v647_v49  ;;  %vm2867_vm0 = vmor %vm649_vm1, %vm650_vm6 }
  0x90   : > { %vm694_vm14 = vweird.f32 %v2496_v13  ;;  %v700_v1 = vand.u32 2147483648, %v2496_v13  ;;  %1709 = vrcp.f32 %v2514_v46  ;;  %vm665_vm11 = vweird.f32 %v2734_v3 }
  0x91   : > { %v677_v17 = vmul.f32 %v2753_v2, %v676_v4  ;;  %vm2873_vm2 = vcmp.eq.f32.partialorder %v683_v59, 8.507059e+37  ;;  %v686_v5 = vor.u32 1.1754944e-38, %v685_v58  ;;  %v720_v39 = vmul.f32 %v2842_v26, %v2503_v16  ;;  %vm2899_vm7 = vmor %vm664_vm10, %vm665_vm11 }
  0x92   : > { %v2879_v28 = vpop.eup %1707  ;;  %v706_v11 = vsub.f32 1.0, %v705_v42  ;;  %vm709_vm5 = vweird.f32 %v2498_v63  ;;  %v713_v61 = vand.u32 2147483647, %v2498_v63  ;;  %1711 = vrcp.f32 %v2531_v35 }
  0x93   : > { %v663_v12 = vadd.f32 %v2734_v3, %v662_v36  ;;  %vm680_vm3 = vweird.f32 %v2753_v2  ;;  %v692_v38 = vmul.f32 %v2794_v48, %v691_v44  ;;  %vm2887_vm15 = vcmp.eq.f32.partialorder %v698_v9, 8.507059e+37 }
  0x94   : > { %v715_v29 = vand.u32 2147483648, %v2498_v63  ;;  %v652_v18 = vsel %vm2867_vm0, %v2689_v23, %v648_v10  ;;  %vm695_vm8 = vweird.f32 %v2794_v48  ;;  %v701_v31 = vor.u32 1.1754944e-38, %v700_v1  ;;  %vm2913_vm12 = vmor %vm679_vm13, %vm680_vm3 }
  0x95   : > { %v728_v19 = vand.u32 2147483647, %v2503_v16  ;;  %v678_v30 = vadd.f32 %v2753_v2, %v677_v17  ;;  %v721_v52 = vsub.f32 1.0, %v720_v39  ;;  %v735_v8 = vmul.f32 %v2879_v28, %v2512_v34  ;;  %vm2939_vm13 = vmor %vm694_vm14, %vm695_vm8 }
  0x96   : > { %1713 = vrcp.f32 %v2539_v54  ;;  %v2909_v23 = vpop.eup %1709  ;;  %v707_v57 = vmul.f32 %v2820_v22, %v706_v11  ;;  %vm2918_vm1 = vcmp.eq.f32.partialorder %v713_v61, 8.507059e+37  ;;  %v730_v51 = vand.u32 2147483648, %v2503_v16 }
  0x97   : > { %1715 = vrcp.f32 %v2541_v6  ;;  %v667_v60 = vsel %vm2899_vm7, %v2734_v3, %v663_v12  ;;  %v693_v50 = vadd.f32 %v2794_v48, %v692_v38  ;;  %v716_v49 = vor.u32 1.1754944e-38, %v715_v29  ;;  %v4478_v29 = vld [vmem:[#allocation13_spill] sm:$0xff] }
  0x98   : > { %vm724_vm10 = vweird.f32 %v2503_v16  ;;  %v2929_v4 = vpop.eup %1711  ;;  %v2933_v59 = vsel %vm2835_vm9, %v656_v53, %v652_v18  ;;  %vm710_vm6 = vweird.f32 %v2820_v22  ;;  %v743_v3 = vand.u32 2147483647, %v2512_v34 }
  0x99   : > { %v745_v42 = vand.u32 2147483648, %v2512_v34  ;;  %v682_v0 = vsel %vm2913_vm12, %v2753_v2, %v678_v30  ;;  %v722_v53 = vmul.f32 %v2842_v26, %v721_v52  ;;  %vm2950_vm9 = vcmp.eq.f32.partialorder %v728_v19, 8.507059e+37  ;;  %vm2969_vm14 = vmor %vm709_vm5, %vm710_vm6 }
  0x9a   : > { %v736_v13 = vsub.f32 1.0, %v735_v8  ;;  %v750_v44 = vmul.f32 %v2909_v23, %v2514_v46  ;;  %v2958_v9 = vsel %vm2856_vm4, %v671_v41, %v667_v60  ;;  %v708_v10 = vadd.f32 %v2820_v22, %v707_v57 }
  0x9b   : > { %v731_v1 = vor.u32 1.1754944e-38, %v730_v51  ;;  %1717 = vrcp.f32 %v2549_v27  ;;  %v697_v55 = vsel %vm2939_vm13, %v2794_v48, %v693_v50  ;;  %vm725_vm4 = vweird.f32 %v2842_v26 }
  0x9c   : > { %v2962_v2 = vpop.eup %1713  ;;  %vm739_vm0 = vweird.f32 %v2512_v34  ;;  %v765_v43 = vmul.f32 %v2929_v4, %v2531_v35  ;;  %v2981_v39 = vsel %vm2873_vm2, %v686_v5, %v682_v0  ;;  %v746_v48 = vor.u32 1.1754944e-38, %v745_v42  ;;  %vm3003_vm2 = vmor %vm724_vm10, %vm725_vm4 }
  0x9d   : > { %v2977_v41 = vpop.eup %1715  ;;  %vm754_vm11 = vweird.f32 %v2514_v46  ;;  %v758_v63 = vand.u32 2147483647, %v2514_v46  ;;  %v723_v11 = vadd.f32 %v2842_v26, %v722_v53  ;;  %v737_v61 = vmul.f32 %v2879_v28, %v736_v13 }
  0x9e   : > { %vm2987_vm5 = vcmp.eq.f32.partialorder %v743_v3, 8.507059e+37  ;;  %v751_v38 = vsub.f32 1.0, %v750_v44  ;;  %1719 = vrcp.f32 %v4478_v29  ;;  %v2994_v32 = vsel %vm2887_vm15, %v701_v31, %v697_v55 }
  0x9f   : > { %v712_v5 = vsel %vm2969_vm14, %v2820_v22, %v708_v10  ;;  %v760_v7 = vand.u32 2147483648, %v2514_v46  ;;  %v780_v19 = vmul.f32 %v2962_v2, %v2539_v54  ;;  %vm740_vm3 = vweird.f32 %v2879_v28  ;;  %v4481_v22 = vld [vmem:[#allocation14_spill] sm:$0xff] }
  0xa0   : > { %v766_v20 = vsub.f32 1.0, %v765_v43  ;;  %v795_v31 = vmul.f32 %v2977_v41, %v2541_v6  ;;  %1721 = vrcp.f32 %v4481_v22  ;;  %vm769_vm15 = vweird.f32 %v2531_v35  ;;  %vm3035_vm8 = vmor %vm739_vm0, %vm740_vm3 }
  0xa1   : > { %v3014_v30 = vpop.eup %1717  ;;  %v773_v16 = vand.u32 2147483647, %v2531_v35  ;;  %v775_v52 = vand.u32 2147483648, %v2531_v35  ;;  %v790_v8 = vand.u32 2147483648, %v2539_v54  ;;  %v3022_v40 = vsel %vm2918_vm1, %v716_v49, %v712_v5 }
  0xa2   : > { %v727_v57 = vsel %vm3003_vm2, %v2842_v26, %v723_v11  ;;  %v738_v51 = vadd.f32 %v2879_v28, %v737_v61  ;;  %v752_v60 = vmul.f32 %v2909_v23, %v751_v38  ;;  %vm3029_vm7 = vcmp.eq.f32.partialorder %v758_v63, 8.507059e+37 }
  0xa3   : > { %v761_v21 = vor.u32 1.1754944e-38, %v760_v7  ;;  %v781_v49 = vsub.f32 1.0, %v780_v19  ;;  %vm784_vm12 = vweird.f32 %v2539_v54  ;;  %v788_v26 = vand.u32 2147483647, %v2539_v54 }
  0xa4   : > { %v3041_v3 = vpop.eup %1719  ;;  %vm755_vm1 = vweird.f32 %v2909_v23  ;;  %v767_v42 = vmul.f32 %v2929_v4, %v766_v20  ;;  %v796_v0 = vsub.f32 1.0, %v795_v31  ;;  %v810_v34 = vmul.f32 %v3014_v30, %v2549_v27 }
  0xa5   : > { %v3049_v53 = vsel %vm2950_vm9, %v731_v1, %v727_v57  ;;  %vm3051_vm10 = vcmp.eq.f32.partialorder %v773_v16, 8.507059e+37  ;;  %v776_v44 = vor.u32 1.1754944e-38, %v775_v52  ;;  %v791_v10 = vor.u32 1.1754944e-38, %v790_v8  ;;  %vm3065_vm6 = vmor %vm754_vm11, %vm755_vm1 }
  0xa6   : > { %v3055_v55 = vpop.eup %1721  ;;  %v742_v17 = vsel %vm3035_vm8, %v2879_v28, %v738_v51  ;;  %v753_v43 = vadd.f32 %v2909_v23, %v752_v60  ;;  %vm770_vm13 = vweird.f32 %v2929_v4  ;;  %v803_v36 = vand.u32 2147483647, %v2541_v6 }
  0xa7   : > { %v782_v63 = vmul.f32 %v2962_v2, %v781_v49  ;;  %vm3070_vm9 = vcmp.eq.f32.partialorder %v788_v26, 8.507059e+37  ;;  %vm799_vm14 = vweird.f32 %v2541_v6  ;;  %v805_v28 = vand.u32 2147483648, %v2541_v6  ;;  %vm3087_vm0 = vmor %vm769_vm15, %vm770_vm13 }
  0xa8   : > { %v825_v61 = vmul.f32 %v3041_v3, %v4478_v29  ;;  %v768_v38 = vadd.f32 %v2929_v4, %v767_v42  ;;  %v797_v46 = vmul.f32 %v2977_v41, %v796_v0  ;;  %v811_v5 = vsub.f32 1.0, %v810_v34 }
  0xa9   : > { %vm814_vm4 = vweird.f32 %v2549_v27  ;;  %v3083_v18 = vsel %vm2987_vm5, %v746_v48, %v742_v17  ;;  %vm785_vm11 = vweird.f32 %v2962_v2  ;;  %v818_v19 = vand.u32 2147483647, %v2549_v27 }
  0xaa   : > { %v840_v20 = vmul.f32 %v3055_v55, %v4481_v22  ;;  %v757_v31 = vsel %vm3065_vm6, %v2909_v23, %v753_v43  ;;  %vm800_vm5 = vweird.f32 %v2977_v41  ;;  %vm3099_vm2 = vcmp.eq.f32.partialorder %v803_v36, 8.507059e+37  ;;  %vm3111_vm15 = vmor %vm784_vm12, %vm785_vm11 }
  0xab   : > { %v820_v35 = vand.u32 2147483648, %v2549_v27  ;;  %v783_v12 = vadd.f32 %v2962_v2, %v782_v63  ;;  %v806_v16 = vor.u32 1.1754944e-38, %v805_v28  ;;  %v826_v52 = vsub.f32 1.0, %v825_v61  ;;  %vm3124_vm8 = vmor %vm799_vm14, %vm800_vm5 }
  0xac   : > { %vm829_vm3 = vweird.f32 %v4478_v29  ;;  %v772_v8 = vsel %vm3087_vm0, %v2929_v4, %v768_v38  ;;  %v798_v57 = vadd.f32 %v2977_v41, %v797_v46  ;;  %v812_v51 = vmul.f32 %v3014_v30, %v811_v5 }
  0xad   : > { %v833_v60 = vand.u32 2147483647, %v4478_v29  ;;  %v3120_v58 = vsel %vm3029_vm7, %v761_v21, %v757_v31  ;;  %vm3128_vm12 = vcmp.eq.f32.partialorder %v818_v19, 8.507059e+37  ;;  %v841_v49 = vsub.f32 1.0, %v840_v20 }
  0xae   : > { %v854_v26 = vmax.f32 %v2694_v15, 0.001  ;;  %vm815_vm1 = vweird.f32 %v3014_v30  ;;  %v821_v42 = vor.u32 1.1754944e-38, %v820_v35  ;;  %v835_v50 = vand.u32 2147483648, %v4478_v29 }
  0xaf   : > { %v855_v21 = vmax.f32 %v2715_v37, 0.001  ;;  %v3138_v6 = vsel %vm3051_vm10, %v776_v44, %v772_v8  ;;  %v787_v0 = vsel %vm3111_vm15, %v2962_v2, %v783_v12  ;;  %v827_v34 = vmul.f32 %v3041_v3, %v826_v52  ;;  %vm3156_vm13 = vmor %vm814_vm4, %vm815_vm1 }
  0xb0   : > { %v848_v17 = vand.u32 2147483647, %v4481_v22  ;;  %v802_v15 = vsel %vm3124_vm8, %v2977_v41, %v798_v57  ;;  %v813_v43 = vadd.f32 %v3014_v30, %v812_v51  ;;  %vm3149_vm7 = vcmp.eq.f32.partialorder %v833_v60, 8.507059e+37 }
  0xb1   : > { %vm844_vm10 = vweird.f32 %v4481_v22  ;;  %vm830_vm6 = vweird.f32 %v3041_v3  ;;  %v842_v13 = vmul.f32 %v3055_v55, %v841_v49  ;;  %v856_v41 = vmax.f32 %v2748_v56, 0.001 }
  0xb2   : > { %v3163_v44 = vmin.f32 %v854_v26, 0.999  ;;  %v3167_v36 = vsel %vm3070_vm9, %v791_v10, %v787_v0  ;;  %v836_v1 = vor.u32 1.1754944e-38, %v835_v50  ;;  %v850_v63 = vand.u32 2147483648, %v4481_v22  ;;  %vm3187_vm9 = vmor %vm829_vm3, %vm830_vm6 }
  0xb3   : > { %v3170_v27 = vmin.f32 %v855_v21, 0.999  ;;  %v3174_v28 = vsel %vm3099_vm2, %v806_v16, %v802_v15  ;;  %v828_v61 = vadd.f32 %v3041_v3, %v827_v34  ;;  %vm845_vm14 = vweird.f32 %v3055_v55 }
  0xb4   : > { %vm3178_vm4 = vcmp.eq.f32.partialorder %v848_v17, 8.507059e+37  ;;  %v817_v10 = vsel %vm3156_vm13, %v3014_v30, %v813_v43  ;;  %v857_v38 = vmax.f32 %v2758_v14, 0.001  ;;  %v858_v46 = vmax.f32 %v2763_v24, 0.001  ;;  %vm3203_vm0 = vmor %vm844_vm10, %vm845_vm14 }
  0xb5   : > { %v859_v5 = vmax.f32 %v2778_v33, 0.001  ;;  %v843_v7 = vadd.f32 %v3055_v55, %v842_v13  ;;  %v860_v19 = vmax.f32 %v2783_v45, 0.001  ;;  %v3196_v20 = vmin.f32 %v856_v41, 0.999 }
  0xb6   : > { %v3199_v30 = vsub.f32 1.0, %v3163_v44  ;;  %v851_v14 = vor.u32 1.1754944e-38, %v850_v63  ;;  %v861_v24 = vmax.f32 %v2831_v62, 0.001  ;;  %v862_v33 = vmax.f32 %v2846_v47, 0.001 }
  0xb7   : > { %4510 = vst [vmem:[#allocation13_spill] sm:$0xff] %v3196_v20  ;;  %v3210_v31 = vsub.f32 1.0, %v3170_v27  ;;  %v832_v45 = vsel %vm3187_vm9, %v3041_v3, %v828_v61  ;;  %v863_v48 = vmax.f32 %v2850_v25, 0.001  ;;  %v864_v22 = vmax.f32 %v2933_v59, 0.001 }
  0xb8   : > { %v865_v35 = vmax.f32 %v2958_v9, 0.001  ;;  %v822_v12 = vsel %vm3128_vm12, %v821_v42, %v817_v10  ;;  %v866_v62 = vmax.f32 %v2981_v39, 0.001  ;;  %v867_v47 = vmax.f32 %v2994_v32, 0.001 }
  0xb9   : > { %v868_v16 = vmax.f32 %v3022_v40, 0.001  ;;  %v847_v52 = vsel %vm3203_vm0, %v3055_v55, %v843_v7  ;;  %v3226_v3 = vmin.f32 %v857_v38, 0.999  ;;  %v3229_v25 = vsub.f32 1.0, %v3196_v20 }
  0xba   : > { %1723 = vrsqrt.f32 %v3199_v30  ;;  %v837_v59 = vsel %vm3149_vm7, %v836_v1, %v832_v45  ;;  %v869_v9 = vmax.f32 %v3049_v53, 0.001  ;;  %v3235_v39 = vmin.f32 %v858_v46, 0.999 }
  0xbb   : > { %4513 = vst [vmem:[#allocation14_spill] sm:$0xff] %v3226_v3  ;;  %1725 = vrsqrt.f32 %v3210_v31  ;;  %v870_v32 = vmax.f32 %v3083_v18, 0.001  ;;  %v871_v40 = vmax.f32 %v3120_v58, 0.001  ;;  %v852_v8 = vsel %vm3178_vm4, %v851_v14, %v847_v52 }
  0xbc   : > { %4514 = vst [vmem:[#allocation15_spill] sm:$0xff] %v3235_v39  ;;  %v3240_v55 = vmin.f32 %v859_v5, 0.999  ;;  %v872_v23 = vmax.f32 %v3138_v6, 0.001  ;;  %v3248_v4 = vsub.f32 1.0, %v3226_v3  ;;  %1727 = vrsqrt.f32 %v3229_v25 }
  0xbd   : > { %v873_v57 = vmax.f32 %v3167_v36, 0.001  ;;  %v874_v51 = vmax.f32 %v3174_v28, 0.001  ;;  %v875_v53 = vmax.f32 %v822_v12, 0.001  ;;  %vm956_vm11 = vweird.f32 %v3199_v30 }
  0xbe   : > { %4515 = vst [vmem:[#allocation16_spill] sm:$0xff] %v3240_v55  ;;  %v876_v60 = vmax.f32 %v837_v59, 0.001  ;;  %v3251_v18 = vmin.f32 %v860_v19, 0.999  ;;  %v3256_v54 = vsub.f32 1.0, %v3235_v39  ;;  %1729 = vrsqrt.f32 %v3248_v4 }
  0xbf   : > { %4516 = vst [vmem:[#allocation17_spill] sm:$0xff] %v3248_v4  ;;  %v3253_v58 = vmin.f32 %v861_v24, 0.999  ;;  %v877_v26 = vmax.f32 %v852_v8, 0.001  ;;  %v3263_v50 = vsub.f32 1.0, %v3240_v55  ;;  %vm966_vm2 = vweird.f32 %v3210_v31 }
  0xc0   : > { %4517 = vst [vmem:[#allocation18_spill] sm:$0xff] %v3251_v18  ;;  %v3258_v49 = vpop.eup %1723  ;;  %v3260_v42 = vmin.f32 %v862_v33, 0.999  ;;  %v3267_v6 = vmin.f32 %v863_v48, 0.999  ;;  %v3283_v2 = vsub.f32 1.0, %v3251_v18  ;;  %1731 = vrsqrt.f32 %v3256_v54 }
  0xc1   : > { %4518 = vst [vmem:[#allocation19_spill] sm:$0xff] %v3253_v58  ;;  %v3265_v21 = vpop.eup %1725  ;;  %v3269_v0 = vmin.f32 %v864_v22, 0.999  ;;  %v3271_v34 = vmin.f32 %v865_v35, 0.999  ;;  %v951_v13 = vmul.f32 %v3258_v49, %v3199_v30  ;;  %v3293_v1 = vsub.f32 1.0, %v3253_v58 }
  0xc2   : > { %4519 = vst [vmem:[#allocation20_spill] sm:$0xff] %v3256_v54  ;;  %v3273_v17 = vmin.f32 %v866_v62, 0.999  ;;  %v3275_v15 = vmin.f32 %v867_v47, 0.999  ;;  %v3288_v41 = vpop.eup %1727  ;;  %v961_v63 = vmul.f32 %v3265_v21, %v3210_v31  ;;  %1733 = vrsqrt.f32 %v3263_v50 }
  0xc3   : > { %4520 = vst [vmem:[#allocation21_spill] sm:$0xff] %v3260_v42  ;;  %v3277_v43 = vmin.f32 %v868_v16, 0.999  ;;  %v3280_v37 = vmin.f32 %v869_v9, 0.999  ;;  %v3311_v46 = vsub.f32 1.0, %v3260_v42  ;;  %v952_v5 = vmul.f32 %v3258_v49, %v951_v13 }
  0xc4   : > { %4521 = vst [vmem:[#allocation22_spill] sm:$0xff] %v3263_v50  ;;  %v3290_v36 = vmin.f32 %v870_v32, 0.999  ;;  %v3298_v28 = vmin.f32 %v871_v40, 0.999  ;;  %v971_v7 = vmul.f32 %v3288_v41, %v3229_v25  ;;  %1735 = vrsqrt.f32 %v3283_v2  ;;  %v3317_v19 = vpop.eup %1729 }
  0xc5   : > { %4522 = vst [vmem:[#allocation23_spill] sm:$0xff] %v3267_v6  ;;  %v3300_v61 = vmin.f32 %v872_v23, 0.999  ;;  %v3302_v56 = vmin.f32 %v873_v57, 0.999  ;;  %v3322_v14 = vsub.f32 1.0, %v3267_v6  ;;  %v962_v24 = vmul.f32 %v3265_v21, %v961_v63 }
  0xc6   : > { %4523 = vst [vmem:[#allocation24_spill] sm:$0xff] %v3269_v0  ;;  %v3304_v10 = vmin.f32 %v874_v51, 0.999  ;;  %v3306_v11 = vmin.f32 %v875_v53, 0.999  ;;  %1737 = vrsqrt.f32 %v3293_v1  ;;  %v3326_v33 = vpop.eup %1731  ;;  %v3329_v45 = vsub.f32 1.0, %v3269_v0 }
  0xc7   : > { %4524 = vst [vmem:[#allocation25_spill] sm:$0xff] %v3271_v34  ;;  %v3308_v38 = vmin.f32 %v876_v60, 0.999  ;;  %v3319_v29 = vmin.f32 %v877_v26, 0.999  ;;  %v3332_v48 = vsub.f32 1.0, %v3271_v34  ;;  %v972_v9 = vmul.f32 %v3288_v41, %v971_v7 }
  0xc8   : > { %4525 = vst [vmem:[#allocation26_spill] sm:$0xff] %v3273_v17  ;;  %v3335_v22 = vsub.f32 1.0, %v3273_v17  ;;  %v3338_v35 = vsub.f32 1.0, %v3275_v15  ;;  %v3340_v12 = vpop.eup %1733  ;;  %v3343_v62 = vsub.f32 1.0, %v3277_v43  ;;  %v3346_v47 = vsub.f32 1.0, %v3280_v37 }
  0xc9   : > { %4526 = vst [vmem:[#allocation27_spill] sm:$0xff] %v3275_v15  ;;  %v3349_v16 = vsub.f32 1.0, %v3290_v36  ;;  %v3352_v52 = vsub.f32 1.0, %v3298_v28  ;;  %v953_v59 = vmul.f32 0.5, %v952_v5  ;;  %v981_v32 = vmul.f32 %v3317_v19, %v3248_v4 }
  0xca   : > { %4527 = vst [vmem:[#allocation28_spill] sm:$0xff] %v3277_v43  ;;  %1739 = vrsqrt.f32 %v3311_v46  ;;  %v3359_v40 = vsub.f32 1.0, %v3300_v61  ;;  %v3362_v8 = vsub.f32 1.0, %v3302_v56  ;;  %v963_v23 = vmul.f32 0.5, %v962_v24  ;;  %v3365_v57 = vpop.eup %1735 }
  0xcb   : > { %4528 = vst [vmem:[#allocation29_spill] sm:$0xff] %v3280_v37  ;;  %1741 = vrsqrt.f32 %v3322_v14  ;;  %v3368_v51 = vsub.f32 1.0, %v3304_v10  ;;  %v991_v53 = vmul.f32 %v3326_v33, %v3256_v54  ;;  %v1001_v60 = vmul.f32 %v3340_v12, %v3263_v50 }
  0xcc   : > { %4529 = vst [vmem:[#allocation30_spill] sm:$0xff] %v3283_v2  ;;  %1743 = vrsqrt.f32 %v3329_v45  ;;  %v3375_v26 = vpop.eup %1737  ;;  %v3378_v13 = vsub.f32 1.0, %v3306_v11  ;;  %v3381_v63 = vsub.f32 1.0, %v3308_v38  ;;  %v3384_v5 = vsub.f32 1.0, %v3319_v29 }
  0xcd   : > { %4530 = vst [vmem:[#allocation31_spill] sm:$0xff] %v3290_v36  ;;  %v954_v7 = vsub.f32 1.5, %v953_v59  ;;  %v973_v24 = vmul.f32 0.5, %v972_v9  ;;  %1745 = vrsqrt.f32 %v3332_v48  ;;  %vm957_vm5 = vweird.f32 %v3258_v49 }
  0xce   : > { %4531 = vst [vmem:[#allocation32_spill] sm:$0xff] %v3293_v1  ;;  %v1021_v59 = vmul.f32 %v3375_v26, %v3293_v1  ;;  %1747 = vrsqrt.f32 %v3335_v22  ;;  %vm967_vm3 = vweird.f32 %v3265_v21  ;;  %vm976_vm15 = vweird.f32 %v3229_v25  ;;  %vm3416_vm1 = vmor %vm956_vm11, %vm957_vm5 }
  0xcf   : > { %4532 = vst [vmem:[#allocation33_spill] sm:$0xff] %v3298_v28  ;;  %vm986_vm8 = vweird.f32 %v3248_v4  ;;  %1749 = vrsqrt.f32 %v3338_v35  ;;  %vm996_vm12 = vweird.f32 %v3256_v54  ;;  %vm977_vm7 = vweird.f32 %v3288_v41  ;;  %vm3435_vm13 = vmor %vm966_vm2, %vm967_vm3 }
  0xd0   : > { %4533 = vst [vmem:[#allocation34_spill] sm:$0xff] %v3300_v61  ;;  %v1002_v61 = vmul.f32 %v3340_v12, %v1001_v60  ;;  %vm1006_vm10 = vweird.f32 %v3263_v50  ;;  %v1022_v15 = vmul.f32 %v3375_v26, %v1021_v59  ;;  %vm987_vm6 = vweird.f32 %v3317_v19  ;;  %vm3463_vm0 = vmor %vm976_vm15, %vm977_vm7 }
  0xd1   : > { %4534 = vst [vmem:[#allocation35_spill] sm:$0xff] %v3302_v56  ;;  %v964_v56 = vsub.f32 1.5, %v963_v23  ;;  %v3409_v23 = vmul.f32 %v3258_v49, %v954_v7  ;;  %vm1016_vm14 = vweird.f32 %v3283_v2  ;;  %1751 = vrsqrt.f32 %v3343_v62  ;;  %vm3497_vm15 = vmor %vm986_vm8, %vm987_vm6 }
  0xd2   : > { %4535 = vst [vmem:[#allocation36_spill] sm:$0xff] %v3304_v10  ;;  %v982_v10 = vmul.f32 %v3317_v19, %v981_v32  ;;  %v1003_v43 = vmul.f32 0.5, %v1002_v61  ;;  %vm997_vm4 = vweird.f32 %v3326_v33  ;;  %vm1026_vm9 = vweird.f32 %v3293_v1 }
  0xd3   : > { %4536 = vst [vmem:[#allocation37_spill] sm:$0xff] %v3306_v11  ;;  %v3393_v11 = vpop.eup %1739  ;;  %vm1007_vm11 = vweird.f32 %v3340_v12  ;;  %v1023_v55 = vmul.f32 0.5, %v1022_v15  ;;  %vm1017_vm5 = vweird.f32 %v3365_v57  ;;  %vm1036_vm2 = vweird.f32 %v3311_v46  ;;  %vm3516_vm6 = vmor %vm996_vm12, %vm997_vm4 }
  0xd4   : > { %4537 = vst [vmem:[#allocation38_spill] sm:$0xff] %v3308_v38  ;;  %v1011_v38 = vmul.f32 %v3365_v57, %v3283_v2  ;;  %v3400_v9 = vpop.eup %1741  ;;  %v983_v60 = vmul.f32 0.5, %v982_v10  ;;  %v1031_v7 = vmul.f32 %v3393_v11, %v3311_v46  ;;  %v1004_v18 = vsub.f32 1.5, %v1003_v43  ;;  %vm3531_vm12 = vmor %vm1006_vm10, %vm1007_vm11 }
  0xd5   : > { %4538 = vst [vmem:[#allocation39_spill] sm:$0xff] %v3311_v46  ;;  %v3406_v32 = vpop.eup %1743  ;;  %vm1027_vm3 = vweird.f32 %v3375_v26  ;;  %1753 = vrsqrt.f32 %v3346_v47  ;;  %vm1056_vm8 = vweird.f32 %v3329_v45  ;;  %vm1037_vm4 = vweird.f32 %v3393_v11  ;;  %vm3552_vm10 = vmor %vm1016_vm14, %vm1017_vm5 }
  0xd6   : > { %4539 = vst [vmem:[#allocation40_spill] sm:$0xff] %v3319_v29  ;;  %v992_v29 = vmul.f32 %v3326_v33, %v991_v53  ;;  %v974_v53 = vsub.f32 1.5, %v973_v24  ;;  %v1012_v36 = vmul.f32 %v3365_v57, %v1011_v38  ;;  %v3425_v10 = vpop.eup %1745  ;;  %v3428_v24 = vmul.f32 %v3265_v21, %v964_v56  ;;  %vm3572_vm14 = vmor %vm1026_vm9, %vm1027_vm3 }
  0xd7   : > { %4540 = vst [vmem:[#allocation41_spill] sm:$0xff] %v3322_v14  ;;  %v1041_v56 = vmul.f32 %v3400_v9, %v3322_v14  ;;  %v1051_v61 = vmul.f32 %v3406_v32, %v3329_v45  ;;  %v3446_v38 = vpop.eup %1747  ;;  %v984_v34 = vsub.f32 1.5, %v983_v60  ;;  %v1061_v60 = vmul.f32 %v3425_v10, %v3332_v48  ;;  %vm3601_vm3 = vmor %vm1036_vm2, %vm1037_vm4 }
  0xd8   : > { %4541 = vst [vmem:[#allocation42_spill] sm:$0xff] %v3326_v33  ;;  %v993_v37 = vmul.f32 0.5, %v992_v29  ;;  %v3453_v59 = vmul.f32 %v3288_v41, %v974_v53  ;;  %v3457_v0 = vpop.eup %1749  ;;  %v1013_v29 = vmul.f32 0.5, %v1012_v36  ;;  %v1032_v53 = vmul.f32 %v3393_v11, %v1031_v7 }
  0xd9   : > { %4542 = vst [vmem:[#allocation43_spill] sm:$0xff] %v3329_v45  ;;  %v1042_v39 = vmul.f32 %v3400_v9, %v1041_v56  ;;  %v1052_v36 = vmul.f32 %v3406_v32, %v1051_v61  ;;  %v1071_v7 = vmul.f32 %v3446_v38, %v3335_v22  ;;  %v1081_v15 = vmul.f32 %v3457_v0, %v3338_v35  ;;  %v3491_v43 = vpop.eup %1751 }
  0xda   : > { %4543 = vst [vmem:[#allocation44_spill] sm:$0xff] %v3332_v48  ;;  %v994_v58 = vsub.f32 1.5, %v993_v37  ;;  %v3486_v37 = vmul.f32 %v3317_v19, %v984_v34  ;;  %v1014_v61 = vsub.f32 1.5, %v1013_v29  ;;  %v1033_v3 = vmul.f32 0.5, %v1032_v53 }
  0xdb   : > { %4544 = vst [vmem:[#allocation45_spill] sm:$0xff] %v3335_v22  ;;  %v1062_v34 = vmul.f32 %v3425_v10, %v1061_v60  ;;  %v3508_v20 = vmul.f32 %v3340_v12, %v1004_v18  ;;  %1755 = vrsqrt.f32 %v3349_v16  ;;  %v4564_v29 = vmov 0 }
  0xdc   : > { %4545 = vst [vmem:[#allocation46_spill] sm:$0xff] %v3338_v35  ;;  %v3505_v42 = vmul.f32 %v3326_v33, %v994_v58  ;;  %v4565_v29 = vsel %vm3516_vm6, 4294967295, %v4564_v29  ;;  %v1043_v53 = vmul.f32 0.5, %v1042_v39  ;;  %v1053_v60 = vmul.f32 0.5, %v1052_v36 }
  0xdd   : > { %4546 = vst [vmem:[#allocation47_spill] sm:$0xff] %v3343_v62  ;;  %v1072_v18 = vmul.f32 %v3446_v38, %v1071_v7  ;;  %1757 = vrsqrt.f32 %v3352_v52  ;;  %v1082_v39 = vmul.f32 %v3457_v0, %v1081_v15  ;;  %v1091_v36 = vmul.f32 %v3491_v43, %v3343_v62 }
  0xde   : > { %4547 = vst [vmem:[#allocation48_spill] sm:$0xff] %v3375_v26  ;;  %1759 = vrsqrt.f32 %v3359_v40  ;;  %v3540_v7 = vmul.f32 %v3365_v57, %v1014_v61  ;;  %v1034_v54 = vsub.f32 1.5, %v1033_v3  ;;  %vm1047_vm11 = vweird.f32 %v3400_v9  ;;  %v3562_v61 = vpop.eup %1753 }
  0xdf   : > { %4548 = vst [vmem:[#allocation49_spill] sm:$0xff] %v3393_v11  ;;  %1761 = vrsqrt.f32 %v3362_v8  ;;  %v1044_v50 = vsub.f32 1.5, %v1043_v53  ;;  %v1054_v2 = vsub.f32 1.5, %v1053_v60  ;;  %vm1057_vm5 = vweird.f32 %v3406_v32 }
  0xe0   : > { %4549 = vst [vmem:[#allocation50_spill] sm:$0xff] %v3400_v9  ;;  %1763 = vrsqrt.f32 %v3368_v51  ;;  %v3588_v53 = vmul.f32 %v3393_v11, %v1034_v54  ;;  %v1101_v54 = vmul.f32 %v3562_v61, %v3346_v47  ;;  %vm4582_vm2 = vweird.f32 %v3322_v14 }
  0xe1   : > { %4552 = vst [vmem:[#allocation51_spill] sm:$0xff] %v3425_v10  ;;  %v3576_v33 = vpop.eup %1755  ;;  %1765 = vrsqrt.f32 %v3378_v13  ;;  %vm3622_vm4 = vmor %vm4582_vm2, %vm1047_vm11  ;;  %vm4588_vm2 = vweird.f32 %v3425_v10  ;;  %vm4589_vm7 = vweird.f32 %v3332_v48 }
  0xe2   : > { %4555 = vst [vmem:[#allocation52_spill] sm:$0xff] %v3446_v38  ;;  %1767 = vrsqrt.f32 %v3381_v63  ;;  %vm3637_vm11 = vmor %vm1056_vm8, %vm1057_vm5  ;;  %vm4595_vm8 = vweird.f32 %v3335_v22  ;;  %v4601_v22 = vmov 0  ;;  %vm4605_vm5 = vweird.f32 %v3343_v62 }
  0xe3   : > { %4556 = vst [vmem:[#allocation53_spill] sm:$0xff] %v3453_v59  ;;  %v1024_v59 = vsub.f32 1.5, %v1023_v55  ;;  %v1063_v55 = vmul.f32 0.5, %v1062_v34  ;;  %v3581_v34 = vpop.eup %1757  ;;  %vm3654_vm9 = vmor %vm4589_vm7, %vm4588_vm2  ;;  %1769 = vrsqrt.f32 %v3384_v5  ;;  %vm4594_vm2 = vweird.f32 %v3446_v38 }
  0xe4   : > { %4557 = vst [vmem:[#allocation54_spill] sm:$0xff] %v3457_v0  ;;  %vm4599_vm7 = vweird.f32 %v3457_v0  ;;  %1771 = vlog2.f32 %v3163_v44 }
  0xe5   : > { %4560 = vst [vmem:[#allocation55_spill] sm:$0xff] %v3486_v37  ;;  %v3557_v3 = vmul.f32 %v3375_v26, %v1024_v59  ;;  %v4573_v59 = vmov 0  ;;  %v1092_v37 = vmul.f32 %v3491_v43, %v1091_v36  ;;  %v1064_v60 = vsub.f32 1.5, %v1063_v55 }
  0xe6   : > { %4563 = vst [vmem:[#allocation56_spill] sm:$0xff] %v3505_v42  ;;  %v4574_v59 = vsel %vm3572_vm14, 4294967295, %v4573_v59  ;;  %v1073_v42 = vmul.f32 0.5, %v1072_v18  ;;  %v3591_v18 = vpop.eup %1759  ;;  %v4577_v36 = vmov 0  ;;  %v3610_v55 = vmul.f32 %v3400_v9, %v1044_v50 }
  0xe7   : > { %4566 = vst [vmem:[#allocation57_spill] sm:$0xff] %v4565_v29  ;;  %v1083_v29 = vmul.f32 0.5, %v1082_v39  ;;  %v4578_v36 = vsel %vm3601_vm3, 4294967295, %v4577_v36  ;;  %v3613_v39 = vmul.f32 %v3406_v32, %v1054_v2  ;;  %v3616_v46 = vpop.eup %1761  ;;  %v1111_v50 = vmul.f32 %v3576_v33, %v3349_v16 }
  0xe8   : > { %4569 = vst [vmem:[#allocation58_spill] sm:$0xff] %v3540_v7  ;;  %v1074_v1 = vsub.f32 1.5, %v1073_v42  ;;  %v4585_v2 = vmov 0  ;;  %v1131_v14 = vmul.f32 %v3591_v18, %v3359_v40  ;;  %v3648_v7 = vpop.eup %1763  ;;  %v4590_v42 = vmov 0 }
  0xe9   : > { %4572 = vst [vmem:[#allocation59_spill] sm:$0xff] %v3557_v3  ;;  %v4583_v3 = vmov 0  ;;  %v1084_v26 = vsub.f32 1.5, %v1083_v29  ;;  %v4586_v2 = vsel %vm3637_vm11, 4294967295, %v4585_v2  ;;  %v1121_v29 = vmul.f32 %v3581_v34, %v3352_v52  ;;  %v3674_v11 = vpop.eup %1765 }
  0xea   : > { %4575 = vst [vmem:[#allocation60_spill] sm:$0xff] %v4574_v59  ;;  %v4584_v3 = vsel %vm3622_vm4, 4294967295, %v4583_v3  ;;  %v1093_v59 = vmul.f32 0.5, %v1092_v37  ;;  %v3642_v37 = vmul.f32 %v3425_v10, %v1064_v60  ;;  %v4591_v42 = vsel %vm3654_vm9, 4294967295, %v4590_v42  ;;  %vm3684_vm4 = vmor %vm4595_vm8, %vm4594_vm2 }
  0xeb   : > { %4576 = vst [vmem:[#allocation61_spill] sm:$0xff] %v3588_v53  ;;  %v1102_v60 = vmul.f32 %v3562_v61, %v1101_v54  ;;  %v1141_v45 = vmul.f32 %v3616_v46, %v3362_v8  ;;  %v3668_v48 = vmul.f32 %v3446_v38, %v1074_v1  ;;  %v1151_v54 = vmul.f32 %v3648_v7, %v3368_v51 }
  0xec   : > { %4579 = vst [vmem:[#allocation62_spill] sm:$0xff] %v4578_v36  ;;  %v4596_v1 = vmov 0  ;;  %v3689_v53 = vmul.f32 %v3457_v0, %v1084_v26  ;;  %v1112_v9 = vmul.f32 %v3576_v33, %v1111_v50  ;;  %vm4600_vm8 = vweird.f32 %v3338_v35  ;;  %v3709_v50 = vpop.eup %1767 }
  0xed   : > { %4580 = vst [vmem:[#allocation63_spill] sm:$0xff] %v3610_v55  ;;  %v4597_v1 = vsel %vm3684_vm4, 4294967295, %v4596_v1  ;;  %v1094_v55 = vsub.f32 1.5, %v1093_v59  ;;  %vm3701_vm2 = vmor %vm4600_vm8, %vm4599_vm7  ;;  %v1122_v26 = vmul.f32 %v3581_v34, %v1121_v29  ;;  %v1132_v59 = vmul.f32 %v3591_v18, %v1131_v14 }
  0xee   : > { %4581 = vst [vmem:[#allocation64_spill] sm:$0xff] %v3613_v39  ;;  %v4602_v22 = vsel %vm3701_vm2, 4294967295, %v4601_v22  ;;  %v1142_v36 = vmul.f32 %v3616_v46, %v1141_v45  ;;  %v1161_v35 = vmul.f32 %v3674_v11, %v3378_v13  ;;  %v1152_v29 = vmul.f32 %v3648_v7, %v1151_v54 }
  0xef   : > { %4587 = vst [vmem:[#allocation65_spill] sm:$0xff] %v3642_v37  ;;  %v1171_v14 = vmul.f32 %v3709_v50, %v3381_v63  ;;  %v3730_v10 = vmul.f32 %v3491_v43, %v1094_v55  ;;  %v1113_v39 = vmul.f32 0.5, %v1112_v9  ;;  %vm4604_vm7 = vweird.f32 %v3491_v43 }
  0xf0   : > { %4592 = vst [vmem:[#allocation66_spill] sm:$0xff] %v4591_v42  ;;  %v1103_v42 = vmul.f32 0.5, %v1102_v60  ;;  %v3723_v60 = vpop.eup %1769  ;;  %v1162_v37 = vmul.f32 %v3674_v11, %v1161_v35  ;;  %vm3738_vm3 = vmor %vm4605_vm5, %vm4604_vm7  ;;  %v4606_v54 = vmov 0  ;;  %v1133_v38 = vmul.f32 0.5, %v1132_v59 }
  0xf1   : > { %4593 = vst [vmem:[#allocation67_spill] sm:$0xff] %v3668_v48  ;;  %v4607_v54 = vsel %vm3738_vm3, 4294967295, %v4606_v54  ;;  %v1123_v48 = vmul.f32 0.5, %v1122_v26  ;;  %v1172_v55 = vmul.f32 %v3709_v50, %v1171_v14  ;;  %v1181_v9 = vmul.f32 %v3723_v60, %v3384_v5 }
  0xf2   : > { %4598 = vst [vmem:[#allocation68_spill] sm:$0xff] %v3689_v53  ;;  %v1104_v45 = vsub.f32 1.5, %v1103_v42  ;;  %v1143_v35 = vmul.f32 0.5, %v1142_v36  ;;  %v1153_v62 = vmul.f32 0.5, %v1152_v29  ;;  %v1163_v53 = vmul.f32 0.5, %v1162_v37 }
  0xf3   : > { %4603 = vst [vmem:[#allocation69_spill] sm:$0xff] %v4602_v22  ;;  %v1182_v0 = vmul.f32 %v3723_v60, %v1181_v9  ;;  %v1114_v59 = vsub.f32 1.5, %v1113_v39  ;;  %v1173_v42 = vmul.f32 0.5, %v1172_v55  ;;  %v1124_v14 = vsub.f32 1.5, %v1123_v48  ;;  %v4683_v48 = vld [vmem:[#allocation49_spill] sm:$0xff]  ;;  %v4718_v55 = vld [vmem:[#allocation47_spill] sm:$0xff] }
  0xf4   : > { %v1134_v22 = vsub.f32 1.5, %v1133_v38  ;;  %v4608_v37 = vsel %vm3416_vm1, %v3258_v49, %v3409_v23  ;;  %v3764_v9 = vmul.f32 %v3562_v61, %v1104_v45  ;;  %vm4609_vm5 = vweird.f32 %v3562_v61  ;;  %v4620_v45 = vld [vmem:[#allocation13_spill] sm:$0xff] }
  0xf5   : > { %v1183_v36 = vmul.f32 0.5, %v1182_v0  ;;  %v3761_v29 = vmul.f32 %v4608_v37, %v3199_v30  ;;  %vm4610_vm2 = vweird.f32 %v3346_v47  ;;  %v1144_v0 = vsub.f32 1.5, %v1143_v35 }
  0xf6   : > { %vm3770_vm11 = vmor %vm4610_vm2, %vm4609_vm5  ;;  %v4613_v49 = vsel %vm3435_vm13, %v3265_v21, %v3428_v24  ;;  %vm4614_vm2 = vweird.f32 %v3576_v33  ;;  %vm4615_vm5 = vweird.f32 %v3349_v16  ;;  %v1154_v17 = vsub.f32 1.5, %v1153_v62  ;;  %v4618_v21 = vld [vmem:[#allocation53_spill] sm:$0xff] }
  0xf7   : > { %v3781_v28 = vmul.f32 %v4613_v49, %v3210_v31  ;;  %vm3789_vm3 = vmor %vm4615_vm5, %vm4614_vm2  ;;  %v1164_v23 = vsub.f32 1.5, %v1163_v53  ;;  %v4619_v24 = vsel %vm3463_vm0, %v3288_v41, %v4618_v21  ;;  %v1115_v37 = vmul.f32 %v3576_v33, %v1114_v59  ;;  %v4627_v41 = vld [vmem:[#allocation55_spill] sm:$0xff]  ;;  %v4684_v62 = vld [vmem:[#allocation61_spill] sm:$0xff] }
  0xf8   : > { %v3800_v38 = vmul.f32 %v4619_v24, %v3229_v25  ;;  %vm4623_vm5 = vweird.f32 %v3581_v34  ;;  %vm4624_vm1 = vweird.f32 %v3352_v52  ;;  %v1174_v6 = vsub.f32 1.5, %v1173_v42  ;;  %v4648_v42 = vld [vmem:[#allocation56_spill] sm:$0xff] }
  0xf9   : > { %vm3810_vm7 = vmor %vm4624_vm1, %vm4623_vm5  ;;  %v4628_v53 = vsel %vm3497_vm15, %v3317_v19, %v4627_v41  ;;  %v1125_v26 = vmul.f32 %v3581_v34, %v1124_v14  ;;  %v1135_v35 = vmul.f32 %v3591_v18, %v1134_v22  ;;  %vm4633_vm5 = vweird.f32 %v3591_v18  ;;  %v4647_v14 = vld [vmem:[#allocation42_spill] sm:$0xff] }
  0xfa   : > { %v3821_v49 = vmul.f32 %v4628_v53, %v3248_v4  ;;  %vm4634_vm13 = vweird.f32 %v3359_v40  ;;  %v1184_v19 = vsub.f32 1.5, %v1183_v36  ;;  %v1109_v22 = vsel %vm3770_vm11, %v3562_v61, %v3764_v9  ;;  %v4645_v53 = vld [vmem:[#allocation20_spill] sm:$0xff]  ;;  %v4661_v9 = vld [vmem:[#allocation33_spill] sm:$0xff]  ;;  %v4704_v4 = vld [vmem:[#allocation51_spill] sm:$0xff] }
  0xfb   : > { %vm3832_vm0 = vmor %vm4634_vm13, %vm4633_vm5  ;;  %v1145_v24 = vmul.f32 %v3616_v46, %v1144_v0  ;;  %vm4641_vm13 = vweird.f32 %v3616_v46  ;;  %vm4642_vm5 = vweird.f32 %v3362_v8  ;;  %vm1177_vm8 = vweird.f32 %v3709_v50  ;;  %v4660_v0 = vld [vmem:[#allocation31_spill] sm:$0xff] }
  0xfc   : > { %4629 = vst [vmem:[#allocation53_spill] sm:$0xff] %v3821_v49  ;;  %vm3850_vm15 = vmor %vm4642_vm5, %vm4641_vm13  ;;  %v4649_v21 = vsel %vm3516_vm6, %v4647_v14, %v4648_v42  ;;  %v1155_v59 = vmul.f32 %v3648_v7, %v1154_v17  ;;  %vm4653_vm13 = vweird.f32 %v3648_v7  ;;  %vm4654_vm5 = vweird.f32 %v3368_v51  ;;  %v4659_v17 = vld [vmem:[#allocation29_spill] sm:$0xff] }
  0xfd   : > { %v1194_v39 = vmul.f32 %v4649_v21, %v4645_v53  ;;  %vm3869_vm2 = vmor %vm4654_vm5, %vm4653_vm13  ;;  %v1165_v41 = vmul.f32 %v3674_v11, %v1164_v23  ;;  %v4657_v21 = vld [vmem:[#allocation22_spill] sm:$0xff]  ;;  %v4658_v42 = vsel %vm3531_vm12, %v3340_v12, %v3508_v20  ;;  %vm941_vm1 = vcmp.gt.f32.partialorder %v4659_v17, 0.2  ;;  %v4705_v49 = vld [vmem:[#allocation65_spill] sm:$0xff] }
  0xfe   : > { %v1195_v14 = vmul.f32 %v4658_v42, %v4657_v21  ;;  %vm942_vm4 = vcmp.gt.f32.partialorder %v4660_v0, 0.2  ;;  %vm943_vm13 = vcmp.gt.f32.partialorder %v4661_v9, 0.2  ;;  %v1119_v61 = vsel %vm3789_vm3, %v3576_v33, %v1115_v37  ;;  %v4666_v12 = vld [vmem:[#allocation30_spill] sm:$0xff]  ;;  %v4669_v0 = vld [vmem:[#allocation32_spill] sm:$0xff] }
  0xff   : > { %vm4662_vm5 = vweird.f32 %v3674_v11  ;;  %vm4663_vm11 = vweird.f32 %v3378_v13  ;;  %v1175_v20 = vmul.f32 %v3709_v50, %v1174_v6  ;;  %v4667_v23 = vld [vmem:[#allocation58_spill] sm:$0xff]  ;;  %v4671_v33 = vld [vmem:[#allocation48_spill] sm:$0xff]  ;;  %v4672_v37 = vld [vmem:[#allocation59_spill] sm:$0xff]  ;;  %v1129_v15 = vsel %vm3810_vm7, %v3581_v34, %v1125_v26 }
 0x100   : > { %vm3891_vm6 = vmor %vm4663_vm11, %vm4662_vm5  ;;  %v4668_v42 = vsel %vm3552_vm10, %v3365_v57, %v4667_v23  ;;  %v4673_v17 = vsel %vm3572_vm14, %v4671_v33, %v4672_v37  ;;  %v4674_v53 = vld [vmem:[#allocation34_spill] sm:$0xff]  ;;  %v1139_v57 = vsel %vm3832_vm0, %v3591_v18, %v1135_v35  ;;  %vm4677_vm10 = vweird.f32 %v3381_v63  ;;  %v4680_v23 = vld [vmem:[#allocation39_spill] sm:$0xff] }
 0x101   : > { %v1196_v9 = vmul.f32 %v4668_v42, %v4666_v12  ;;  %v1197_v21 = vmul.f32 %v4673_v17, %v4669_v0  ;;  %vm944_vm12 = vcmp.gt.f32.partialorder %v4674_v53, 0.2  ;;  %vm3921_vm14 = vmor %vm4677_vm10, %vm1177_vm8  ;;  %v1185_v17 = vmul.f32 %v3723_v60, %v1184_v19  ;;  %v4681_v42 = vld [vmem:[#allocation62_spill] sm:$0xff]  ;;  %v4686_v33 = vld [vmem:[#allocation37_spill] sm:$0xff] }
 0x102   : > { %vm4682_vm5 = vnez %v4681_v42  ;;  %vm947_vm7 = vcmp.gt.f32.partialorder %v4686_v33, 0.2  ;;  %v4687_v18 = vld [vmem:[#allocation38_spill] sm:$0xff]  ;;  %v1149_v56 = vsel %vm3850_vm15, %v3616_v46, %v1145_v24  ;;  %vm4689_vm8 = vweird.f32 %v3723_v60  ;;  %v4693_v37 = vld [vmem:[#allocation41_spill] sm:$0xff]  ;;  %v4698_v35 = vld [vmem:[#allocation43_spill] sm:$0xff] }
 0x103   : > { %v4685_v34 = vsel %vm4682_vm5, %v4683_v48, %v4684_v62  ;;  %vm948_vm0 = vcmp.gt.f32.partialorder %v4687_v18, 0.2  ;;  %vm4690_vm10 = vweird.f32 %v3384_v5  ;;  %vm4694_vm5 = vnez %v4584_v3  ;;  %v4695_v42 = vld [vmem:[#allocation50_spill] sm:$0xff]  ;;  %v4696_v48 = vld [vmem:[#allocation63_spill] sm:$0xff]  ;;  %v4700_v46 = vld [vmem:[#allocation64_spill] sm:$0xff] }
 0x104   : > { %v1198_v26 = vmul.f32 %v4685_v34, %v4680_v23  ;;  %vm3942_vm3 = vmor %vm4690_vm10, %vm4689_vm8  ;;  %v4697_v62 = vsel %vm4694_vm5, %v4695_v42, %v4696_v48  ;;  %vm4699_vm11 = vnez %v4586_v2  ;;  %v4702_v18 = vld [vmem:[#allocation44_spill] sm:$0xff]  ;;  %v4706_v53 = vsel %vm3654_vm9, %v4704_v4, %v4705_v49  ;;  %v4707_v2 = vld [vmem:[#allocation45_spill] sm:$0xff] }
 0x105   : > { %v1199_v34 = vmul.f32 %v4697_v62, %v4693_v37  ;;  %v4701_v24 = vsel %vm4699_vm11, %v3406_v32, %v4700_v46  ;;  %v1201_v23 = vmul.f32 %v4706_v53, %v4702_v18  ;;  %v1159_v3 = vsel %vm3869_vm2, %v3648_v7, %v1155_v59  ;;  %v4709_v32 = vld [vmem:[#allocation52_spill] sm:$0xff]  ;;  %v4710_v48 = vld [vmem:[#allocation67_spill] sm:$0xff]  ;;  %v4712_v33 = vld [vmem:[#allocation46_spill] sm:$0xff] }
 0x106   : > { %v1200_v36 = vmul.f32 %v4701_v24, %v4698_v35  ;;  %v1169_v42 = vsel %vm3891_vm6, %v3674_v11, %v1165_v41  ;;  %vm4708_vm15 = vnez %v4597_v1  ;;  %v4713_v24 = vld [vmem:[#allocation69_spill] sm:$0xff]  ;;  %v4715_v4 = vld [vmem:[#allocation54_spill] sm:$0xff]  ;;  %v4716_v49 = vld [vmem:[#allocation68_spill] sm:$0xff]  ;;  %v1179_v7 = vsel %vm3921_vm14, %v3709_v50, %v1175_v20 }
 0x107   : > { %v4711_v62 = vsel %vm4708_vm15, %v4709_v32, %v4710_v48  ;;  %vm4714_vm11 = vnez %v4713_v24  ;;  %vm4719_vm9 = vnez %v4607_v54  ;;  %v1205_v59 = vmul.f32 %v1109_v22, %v3346_v47  ;;  %v4732_v19 = vld [vmem:[#allocation16_spill] sm:$0xff] }
 0x108   : > { %v1202_v46 = vmul.f32 %v4711_v62, %v4707_v2  ;;  %v4717_v53 = vsel %vm4714_vm11, %v4715_v4, %v4716_v49  ;;  %v4720_v11 = vsel %vm4719_vm9, %v3491_v43, %v3730_v10  ;;  %v1206_v41 = vmul.f32 %v1119_v61, %v3349_v16  ;;  %v4724_v61 = vld [vmem:[#allocation17_spill] sm:$0xff]  ;;  %v4738_v62 = vld [vmem:[#allocation39_spill] sm:$0xff]  ;;  %v4743_v49 = vld [vmem:[#allocation24_spill] sm:$0xff] }
 0x109   : > { %v1203_v18 = vmul.f32 %v4717_v53, %v4712_v33  ;;  %v1204_v1 = vmul.f32 %v4720_v11, %v4718_v55  ;;  %v1189_v58 = vsel %vm3942_vm3, %v3723_v60, %v1185_v17  ;;  %v1207_v32 = vmul.f32 %v1129_v15, %v3352_v52  ;;  %v4725_v15 = vld [vmem:[#allocation53_spill] sm:$0xff]  ;;  %v4729_v17 = vld [vmem:[#allocation15_spill] sm:$0xff] }
 0x10a   : > { %v1208_v6 = vmul.f32 %v1139_v57, %v3359_v40  ;;  %v1209_v50 = vmul.f32 %v1149_v56, %v3362_v8  ;;  %v1210_v54 = vmul.f32 %v1159_v3, %v3368_v51  ;;  %v1211_v20 = vmul.f32 %v1169_v42, %v3378_v13  ;;  %v4726_v57 = vld [vmem:[#allocation14_spill] sm:$0xff]  ;;  %v4736_v42 = vld [vmem:[#allocation19_spill] sm:$0xff]  ;;  %v4746_v53 = vld [vmem:[#allocation25_spill] sm:$0xff] }
 0x10b   : > { %vm4721_vm2 = vcmp.gt.f32.partialorder %v3163_v44, 0.2  ;;  %vm4722_vm6 = vcmp.gt.f32.partialorder %v3170_v27, 0.2  ;;  %v1212_v60 = vmul.f32 %v1179_v7, %v3381_v63  ;;  %vm4723_vm3 = vcmp.gt.f32.partialorder %v4620_v45, 0.2 }
 0x10c   : > { %v4005_v10 = vsel %vm4721_vm2, %v3761_v29, %v3199_v30  ;;  %v4011_v43 = vsel %vm4722_vm6, %v3781_v28, %v3210_v31  ;;  %v4018_v22 = vsel %vm4723_vm3, %v3800_v38, %v3229_v25  ;;  %vm4727_vm14 = vcmp.gt.f32.partialorder %v4726_v57, 0.2  ;;  %v4728_v29 = vld [vmem:[#allocation20_spill] sm:$0xff]  ;;  %v4731_v28 = vld [vmem:[#allocation22_spill] sm:$0xff]  ;;  %v4741_v4 = vld [vmem:[#allocation23_spill] sm:$0xff] }
 0x10d   : > { %v4024_v30 = vsel %vm4727_vm14, %v4725_v15, %v4724_v61  ;;  %vm4730_vm8 = vcmp.gt.f32.partialorder %v4729_v17, 0.2  ;;  %v1213_v31 = vmul.f32 %v1189_v58, %v3384_v5  ;;  %vm4733_vm10 = vcmp.gt.f32.partialorder %v4732_v19, 0.2  ;;  %v4734_v25 = vld [vmem:[#allocation18_spill] sm:$0xff]  ;;  %v4750_v7 = vld [vmem:[#allocation27_spill] sm:$0xff] }
 0x10e   : > { %v4029_v56 = vsel %vm4730_vm8, %v1194_v39, %v4728_v29  ;;  %v4035_v3 = vsel %vm4733_vm10, %v1195_v14, %v4731_v28  ;;  %vm4735_vm5 = vcmp.gt.f32.partialorder %v4734_v25, 0.2  ;;  %vm4737_vm15 = vcmp.gt.f32.partialorder %v4736_v42, 0.2  ;;  %v4739_v39 = vld [vmem:[#allocation21_spill] sm:$0xff] }
 0x10f   : > { %v4040_v38 = vsel %vm4735_vm5, %v1196_v9, %v4666_v12  ;;  %v4045_v48 = vsel %vm4737_vm15, %v1197_v21, %v4669_v0  ;;  %vm4740_vm11 = vcmp.gt.f32.partialorder %v4739_v39, 0.2  ;;  %vm4742_vm9 = vcmp.gt.f32.partialorder %v4741_v4, 0.2  ;;  %v4745_v12 = vld [vmem:[#allocation44_spill] sm:$0xff]  ;;  %v4748_v21 = vld [vmem:[#allocation26_spill] sm:$0xff] }
 0x110   : > { %v4050_v24 = vsel %vm4740_vm11, %v1198_v26, %v4738_v62  ;;  %v4055_v14 = vsel %vm4742_vm9, %v1199_v34, %v4693_v37  ;;  %vm4744_vm2 = vcmp.gt.f32.partialorder %v4743_v49, 0.2  ;;  %vm4747_vm6 = vcmp.gt.f32.partialorder %v4746_v53, 0.2  ;;  %v4752_v34 = vld [vmem:[#allocation28_spill] sm:$0xff] }
 0x111   : > { %v4060_v9 = vsel %vm4744_vm2, %v1200_v36, %v4698_v35  ;;  %v4065_v0 = vsel %vm4747_vm6, %v1201_v23, %v4745_v12  ;;  %vm4749_vm3 = vcmp.gt.f32.partialorder %v4748_v21, 0.2  ;;  %vm4751_vm14 = vcmp.gt.f32.partialorder %v4750_v7, 0.2  ;;  %v4754_v23 = vld [vmem:[#allocation29_spill] sm:$0xff] }
 0x112   : > { %v4070_v26 = vsel %vm4749_vm3, %v1202_v46, %v4707_v2  ;;  %v4075_v37 = vsel %vm4751_vm14, %v1203_v18, %v4712_v33  ;;  %vm4753_vm8 = vcmp.gt.f32.partialorder %v4752_v34, 0.2  ;;  %v4086_v36 = vsel %vm941_vm1, %v1205_v59, %v3346_v47  ;;  %v4755_v2 = vld [vmem:[#allocation31_spill] sm:$0xff]  ;;  %v4756_v18 = vld [vmem:[#allocation33_spill] sm:$0xff] }
 0x113   : > { %v4080_v35 = vsel %vm4753_vm8, %v1204_v1, %v4718_v55  ;;  %v4091_v46 = vsel %vm942_vm4, %v1206_v41, %v3349_v16  ;;  %v4096_v33 = vsel %vm943_vm13, %v1207_v32, %v3352_v52  ;;  %1773 = vlog2.f32 %v3170_v27  ;;  %v4757_v55 = vld [vmem:[#allocation34_spill] sm:$0xff]  ;;  %v4758_v47 = vld [vmem:[#allocation35_spill] sm:$0xff]  ;;  %v4760_v16 = vld [vmem:[#allocation36_spill] sm:$0xff] }
 0x114   : > { %v4102_v44 = vsel %vm944_vm12, %v1208_v6, %v3359_v40  ;;  %vm4759_vm1 = vcmp.gt.f32.partialorder %v4758_v47, 0.2  ;;  %vm4761_vm4 = vcmp.gt.f32.partialorder %v4760_v16, 0.2  ;;  %1775 = vlog2.f32 %v4620_v45  ;;  %v4762_v52 = vld [vmem:[#allocation37_spill] sm:$0xff]  ;;  %v4763_v40 = vld [vmem:[#allocation38_spill] sm:$0xff] }
 0x115   : > { %v4107_v11 = vsel %vm4759_vm1, %v1209_v50, %v3362_v8  ;;  %v4112_v1 = vsel %vm4761_vm4, %v1210_v54, %v3368_v51  ;;  %v4118_v27 = vsel %vm947_vm7, %v1211_v20, %v3378_v13  ;;  %v4123_v59 = vsel %vm948_vm0, %v1212_v60, %v3381_v63  ;;  %v4764_v8 = vld [vmem:[#allocation40_spill] sm:$0xff] }
 0x116   : > { %vm4765_vm13 = vcmp.gt.f32.partialorder %v4764_v8, 0.2  ;;  %1777 = vlog2.f32 %v4726_v57  ;;  %v1238_v51 = vsub.f32 0.0, %v4005_v10  ;;  %v1239_v45 = vsub.f32 0.0, %v4011_v43 }
 0x117   : > { %v4128_v41 = vsel %vm4765_vm13, %v1213_v31, %v3384_v5  ;;  %v1240_v58 = vsub.f32 0.0, %v4018_v22  ;;  %1779 = vlog2.f32 %v4729_v17  ;;  %v1241_v13 = vsub.f32 0.0, %v4024_v30  ;;  %v1772_v5 = vpop.eup %1771 }
 0x118   : > { %v1242_v63 = vsub.f32 0.0, %v4029_v56  ;;  %v1243_v32 = vsub.f32 0.0, %v4035_v3  ;;  %1781 = vlog2.f32 %v4732_v19  ;;  %v1244_v6 = vsub.f32 0.0, %v4040_v38 }
 0x119   : > { %v1245_v50 = vsub.f32 0.0, %v4045_v48  ;;  %v1246_v54 = vsub.f32 0.0, %v4050_v24  ;;  %1783 = vlog2.f32 %v4734_v25  ;;  %v1774_v20 = vpop.eup %1773  ;;  %v1247_v10 = vsub.f32 0.0, %v4055_v14 }
 0x11a   : > { %v1248_v43 = vsub.f32 0.0, %v4060_v9  ;;  %v1263_v60 = vmul.f32 0.6931472, %v1772_v5  ;;  %1785 = vlog2.f32 %v4736_v42  ;;  %v1776_v22 = vpop.eup %1775  ;;  %v1249_v61 = vsub.f32 0.0, %v4065_v0 }
 0x11b   : > { %v1250_v15 = vsub.f32 0.0, %v4070_v26  ;;  %v1265_v57 = vmul.f32 0.6931472, %v1774_v20  ;;  %1787 = vlog2.f32 %v4739_v39  ;;  %v1251_v29 = vsub.f32 0.0, %v4075_v37 }
 0x11c   : > { %v1778_v30 = vpop.eup %1777  ;;  %v1252_v17 = vsub.f32 0.0, %v4080_v35  ;;  %v1267_v56 = vmul.f32 0.6931472, %v1776_v22  ;;  %1789 = vlog2.f32 %v4741_v4  ;;  %v1253_v28 = vsub.f32 0.0, %v4086_v36 }
 0x11d   : > { %v1780_v31 = vpop.eup %1779  ;;  %v1254_v19 = vsub.f32 0.0, %v4091_v46  ;;  %v1269_v3 = vmul.f32 0.6931472, %v1778_v30  ;;  %1791 = vlog2.f32 %v4743_v49  ;;  %v1255_v38 = vsub.f32 0.0, %v4096_v33 }
 0x11e   : > { %v1782_v25 = vpop.eup %1781  ;;  %v1271_v42 = vmul.f32 0.6931472, %v1780_v31  ;;  %1793 = vlog2.f32 %v4746_v53  ;;  %v1310_v48 = vmul.f32 %v1263_v60, %v1238_v51  ;;  %v1256_v39 = vsub.f32 0.0, %v4102_v44 }
 0x11f   : > { %v1784_v62 = vpop.eup %1783  ;;  %v1273_v24 = vmul.f32 0.6931472, %v1782_v25  ;;  %1795 = vlog2.f32 %v4748_v21  ;;  %v1311_v4 = vmul.f32 %v1265_v57, %v1239_v45  ;;  %v1312_v12 = vmul.f32 %v1267_v56, %v1240_v58 }
 0x120   : > { %v1786_v14 = vpop.eup %1785  ;;  %v1275_v9 = vmul.f32 0.6931472, %v1784_v62  ;;  %1797 = vlog2.f32 %v4750_v7  ;;  %v1314_v49 = vmul.f32 %v1271_v42, %v1242_v63  ;;  %v1313_v20 = vmul.f32 %v1269_v3, %v1241_v13 }
 0x121   : > { %v1788_v0 = vpop.eup %1787  ;;  %v1277_v5 = vmul.f32 0.6931472, %v1786_v14  ;;  %1799 = vlog2.f32 %v4752_v34  ;;  %v1315_v53 = vmul.f32 %v1273_v24, %v1243_v32  ;;  %v1257_v26 = vsub.f32 0.0, %v4107_v11 }
 0x122   : > { %v1790_v51 = vpop.eup %1789  ;;  %v1279_v60 = vmul.f32 0.6931472, %v1788_v0  ;;  %1801 = vlog2.f32 %v4754_v23  ;;  %v1316_v22 = vmul.f32 %v1275_v9, %v1244_v6  ;;  %v1338_v30 = vadd.f32 %v1314_v49, %v1310_v48 }
 0x123   : > { %v1792_v21 = vpop.eup %1791  ;;  %v1281_v45 = vmul.f32 0.6931472, %v1790_v51  ;;  %1803 = vlog2.f32 %v4755_v2  ;;  %v1317_v57 = vmul.f32 %v1277_v5, %v1245_v50  ;;  %v1343_v7 = vadd.f32 %v1315_v53, %v1311_v4 }
 0x124   : > { %v1794_v58 = vpop.eup %1793  ;;  %v1283_v63 = vmul.f32 0.6931472, %v1792_v21  ;;  %1805 = vlog2.f32 %v4756_v18  ;;  %v1318_v56 = vmul.f32 %v1279_v60, %v1246_v54  ;;  %v1348_v34 = vadd.f32 %v1316_v22, %v1312_v12 }
 0x125   : > { %v1796_v13 = vpop.eup %1795  ;;  %v1285_v32 = vmul.f32 0.6931472, %v1794_v58  ;;  %1807 = vlog2.f32 %v4757_v55  ;;  %v1319_v31 = vmul.f32 %v1281_v45, %v1247_v10  ;;  %v1353_v23 = vadd.f32 %v1317_v57, %v1313_v20 }
 0x126   : > { %v1798_v6 = vpop.eup %1797  ;;  %v1287_v3 = vmul.f32 0.6931472, %v1796_v13  ;;  %1809 = vlog2.f32 %v4758_v47  ;;  %v1320_v25 = vmul.f32 %v1283_v63, %v1248_v43  ;;  %v1339_v2 = vadd.f32 %v1338_v30, %v1318_v56 }
 0x127   : > { %v1800_v50 = vpop.eup %1799  ;;  %v1289_v42 = vmul.f32 0.6931472, %v1798_v6  ;;  %1811 = vlog2.f32 %v4760_v16  ;;  %v1321_v48 = vmul.f32 %v1285_v32, %v1249_v61  ;;  %v1344_v18 = vadd.f32 %v1343_v7, %v1319_v31 }
 0x128   : > { %v1802_v54 = vpop.eup %1801  ;;  %v1291_v62 = vmul.f32 0.6931472, %v1800_v50  ;;  %1813 = vlog2.f32 %v4762_v52  ;;  %v1322_v55 = vmul.f32 %v1287_v3, %v1250_v15  ;;  %v1349_v10 = vadd.f32 %v1348_v34, %v1320_v25 }
 0x129   : > { %v1804_v24 = vpop.eup %1803  ;;  %v1293_v4 = vmul.f32 0.6931472, %v1802_v54  ;;  %1815 = vlog2.f32 %v4763_v40  ;;  %v1323_v47 = vmul.f32 %v1289_v42, %v1251_v29  ;;  %v1354_v43 = vadd.f32 %v1353_v23, %v1321_v48 }
 0x12a   : > { %v1806_v16 = vpop.eup %1805  ;;  %v1295_v61 = vmul.f32 0.6931472, %v1804_v24  ;;  %1817 = vlog2.f32 %v4764_v8  ;;  %v1324_v14 = vmul.f32 %v1291_v62, %v1252_v17  ;;  %v1340_v52 = vadd.f32 %v1339_v2, %v1322_v55 }
 0x12b   : > { %v1808_v9 = vpop.eup %1807  ;;  %v1297_v15 = vmul.f32 0.6931472, %v1806_v16  ;;  %v1325_v40 = vmul.f32 %v1293_v4, %v1253_v28  ;;  %v1345_v37 = vadd.f32 %v1344_v18, %v1323_v47  ;;  %v1258_v12 = vsub.f32 0.0, %v4112_v1 }
 0x12c   : > { %v1810_v29 = vpop.eup %1809  ;;  %v1299_v49 = vmul.f32 0.6931472, %v1808_v9  ;;  %v1326_v35 = vmul.f32 %v1295_v61, %v1254_v19  ;;  %v1350_v8 = vadd.f32 %v1349_v10, %v1324_v14  ;;  %v1259_v0 = vsub.f32 0.0, %v4118_v27 }
 0x12d   : > { %v1812_v17 = vpop.eup %1811  ;;  %v1301_v5 = vmul.f32 0.6931472, %v1810_v29  ;;  %v1327_v11 = vmul.f32 %v1297_v15, %v1255_v38  ;;  %v1355_v20 = vadd.f32 %v1354_v43, %v1325_v40  ;;  %v1260_v28 = vsub.f32 0.0, %v4123_v59 }
 0x12e   : > { %v1814_v36 = vpop.eup %1813  ;;  %v1303_v53 = vmul.f32 0.6931472, %v1812_v17  ;;  %v1328_v1 = vmul.f32 %v1299_v49, %v1256_v39  ;;  %v1341_v46 = vadd.f32 %v1340_v52, %v1326_v35  ;;  %v1261_v51 = vsub.f32 0.0, %v4128_v41 }
 0x12f   : > { %v1816_v19 = vpop.eup %1815  ;;  %v1305_v27 = vmul.f32 0.6931472, %v1814_v36  ;;  %v1329_v60 = vmul.f32 %v1301_v5, %v1257_v26  ;;  %v1346_v22 = vadd.f32 %v1345_v37, %v1327_v11 }
 0x130   : > { %v1818_v33 = vpop.eup %1817  ;;  %v1307_v38 = vmul.f32 0.6931472, %v1816_v19  ;;  %v1330_v30 = vmul.f32 %v1303_v53, %v1258_v12  ;;  %v1351_v21 = vadd.f32 %v1350_v8, %v1328_v1 }
 0x131   : > { %v1309_v45 = vmul.f32 0.6931472, %v1818_v33  ;;  %v1331_v57 = vmul.f32 %v1305_v27, %v1259_v0  ;;  %v1356_v7 = vadd.f32 %v1355_v20, %v1329_v60 }
 0x132   : > { %v1332_v44 = vmul.f32 %v1307_v38, %v1260_v28  ;;  %v1342_v59 = vadd.f32 %v1341_v46, %v1330_v30 }
 0x133   : > { %v1333_v39 = vmul.f32 %v1309_v45, %v1261_v51  ;;  %v1347_v58 = vadd.f32 %v1346_v22, %v1331_v57 }
 0x134   : > { %v1352_v41 = vadd.f32 %v1351_v21, %v1332_v44  ;;  %1362 = vst [vmem:[%s237_s15] sm:$0xff] %v1342_v59 }
 0x135   : > { %v1357_v63 = vadd.f32 %v1356_v7, %v1333_v39  ;;  %1363 = vst [vmem:[%s237_s15 + $0x8] sm:$0xff] %v1347_v58 }
 0x136   : > { %1364 = vst [vmem:[%s237_s15 + $0x10] sm:$0xff] %v1352_v41 }
 0x137   : > { %1365 = vst [vmem:[%s237_s15 + $0x18] sm:$0xff] %v1357_v63 }
 0x138   : > { %1906 = shalt.err (!%p1903_p4)
}
 0x139   : > { %1537 = dma.vmem_to_hbm [thread:$0]  (%p2089_p1), %s1381_s22, 512, %s1383_s28, %s1367_s23  }
 0x13a PF: > { %s1394_s6 = sand.u32 1, %s1957_s9   ;;  %p1547_p5 = pnand %p1487_p2, %p2094_p3 }
 0x13b   : > { %s1395_s7 = scalar_lea.sflag [#allocation4], %s1394_s6 }
 0x13c   : > { %p1548_p7 = pneg %p1547_p5 }
 0x13e   : > { %1952 = dma.done.wait (%p1548_p7), %s1395_s7, 512  }
 0x13f   : > { %1954 = vsyncadd (%p1548_p7), %s1395_s7, 4294966784  ;;  %s21_s17 = sadd.s32 1, %s1989_s17   ;;  %s4766_s15 = sld [smem:[#allocation11_spill]] }
 0x140   : > { %p18_p9 = scmp.ge.s32.totalorder %s21_s17, 4   ;;  %s4767_s16 = sld [smem:[#allocation12_spill]] }
 0x141   : > { %s4768_s9 = smov %s1961_s10  ;;  %s4769_s10 = smov %s1965_s11 }
 0x142   : > { %s4770_s11 = smov %s2080_s29  ;;  %s4771_s12 = smov %s1973_s13 }
 0x143   : > { %s4772_s13 = smov %s1977_s14  ;;  %s4773_s14 = smov %s2083_s30 }
 0x144   :  { %20 = sbr.rel (!%p18_p9) target bundleno = 12 (0xc), region = 90 }
 0x149   :  { %1401 = vsyncpa [#allocation3], 1 }
 0x14a   :  { %1403 = vsyncpa [#allocation3 + $0x1], 1 }
 0x14b   :  { %1404 = vsyncpa [#allocation6], 1 }
 0x14c   :  { %1406 = vsyncpa [#allocation6 + $0x1], 1 }
 0x14d   :  { %1407 = vsyncpa [#allocation4], 1 }
 0x14e   :  { %1409 = vsyncpa [#allocation4 + $0x1], 1 }

</bundles_post_ra>
